<compile_context>
chip_gen: v7x
topology: tpu7x:2x2x1
jax: 0.10.0
libtpu: 0.0.40
codegen_flags: <defaults>
</compile_context>

<pallas_src>
import functools

import jax
import jax.numpy as jnp
import numpy as np
from jax.experimental import pallas as pl
from jax.experimental.pallas import tpu as pltpu

# ----------------------------- hyper-params ------------------------------
HIDDEN = 32          # d_model
INNER = 64           # d_hidden of each expert MLP
NUM_GROUPS = 4       # mog_num_group (kept small for the synthetic run)
NUM_EXPERTS = 4      # moe_num_expert per group
MOG_TOP_K = 2
MOE_TOP_K = 2
LN_EPS = 1e-5
TM_MAX = 512         # token-tile rows; a 512x32 f32 block is 64 KiB -> fits every gen


def _round_up(a, b):
    return ((a + b - 1) // b) * b


# ----------------------------- shared math -------------------------------
def _layernorm(x, gamma, beta):
    mu = jnp.mean(x, axis=-1, keepdims=True)
    xc = x - mu
    var = jnp.mean(xc * xc, axis=-1, keepdims=True)
    inv = jax.lax.rsqrt(var + LN_EPS)
    return xc * inv * gamma + beta


def _topk_dense_softmax(logits, k):
    """Dense per-token weights: softmax over the top-k logits, 0 elsewhere.

    NOTE: ties all receive the top-k weight (identical to the pure-JAX reference,
    but differs from torch.topk tie-breaking). Kept entirely in f32.
    """
    neg = jnp.float32(-1e30)
    remaining = logits
    vals = []
    for _ in range(k):
        v = jnp.max(remaining, axis=-1, keepdims=True)
        vals.append(v)
        remaining = jnp.where(remaining >= v, neg, remaining)
    vmax = vals[0]
    exps = [jnp.exp(v - vmax) for v in vals]
    denom = exps[0]
    for e in exps[1:]:
        denom = denom + e
    dense = jnp.zeros_like(logits)
    for v, e in zip(vals, exps):
        dense = jnp.where(logits == v, e / denom, dense)
    return dense


# ------------------------------ the kernel -------------------------------
def _mog_kernel(x_ref, wgg_ref, bgg_ref, lno_g_ref, lno_b_ref,
                wge_ref, bge_ref, eexp_ref,
                w1_ref, b1_ref, w2_ref, b2_ref,
                lng_g_ref, lng_b_ref, out_ref, *,
                mog_top_k, moe_top_k, num_groups, num_experts):
    x = x_ref[...]                                            # (TM, D) f32

    # --- outer group gate on the raw input (f32, per PyTorch forward) ---
    g_logits = jnp.dot(x, wgg_ref[...], preferred_element_type=jnp.float32)
    g_logits = g_logits + bgg_ref[...]                        # (TM, G)
    wg = _topk_dense_softmax(g_logits, mog_top_k)             # dense group scores

    # --- outer LayerNorm feeding every group ---
    z = _layernorm(x, lno_g_ref[...], lno_b_ref[...])         # f32
    z_bf = z.astype(jnp.bfloat16)                             # bf16 MXU operand

    # --- all G inner expert-gate logits in ONE matmul: (TM, G*E) ---
    e_logits_all = jnp.dot(z, wge_ref[...], preferred_element_type=jnp.float32)
    e_logits_all = e_logits_all + bge_ref[...]

    acc = jnp.zeros_like(x)
    for g in range(num_groups):
        we = _topk_dense_softmax(
            e_logits_all[:, g * num_experts:(g + 1) * num_experts], moe_top_k)

        # fused expert MLP of group g: (TM,D)x(D,E*INNER) then (TM,E*INNER)x(E*INNER,D)
        h = jnp.dot(z_bf, w1_ref[g], preferred_element_type=jnp.float32)
        h = jnp.maximum(h + b1_ref[g], 0.0)                   # ReLU (dropout = id)

        # expand each expert's gate score across its INNER-wide slice of h
        scale = jnp.dot(we, eexp_ref[...], preferred_element_type=jnp.float32)
        h_scaled = (h * scale).astype(jnp.bfloat16)

        core = jnp.dot(h_scaled, w2_ref[g], preferred_element_type=jnp.float32)
        core = core + jnp.dot(we, b2_ref[g], preferred_element_type=jnp.float32)

        # CustomizedMoEPositionwiseFF post-lnorm: LN_g(z + core)
        g_out = _layernorm(z + core, lng_g_ref[g], lng_b_ref[g])
        acc = acc + wg[:, g:g + 1] * g_out

    out_ref[...] = x + acc                                    # residual with raw x


# ------------------------------ the wrapper ------------------------------
def _pack_params(p):
    """Pack per-expert weights into per-group fused matmul operands."""
    G, E, D, I = NUM_GROUPS, NUM_EXPERTS, HIDDEN, INNER
    w1_cat = jnp.transpose(p["w1"], (0, 2, 1, 3)).reshape(G, D, E * I)
    w2_cat = p["w2"].reshape(G, E * I, D)
    b1_cat = p["b1"].reshape(G, 1, E * I)
    b2_stk = p["b2"].reshape(G, E, D)
    wge_cat = jnp.transpose(p["wge"], (1, 0, 2)).reshape(D, G * E)
    bge_cat = jnp.transpose(p["bge"], (1, 0, 2)).reshape(1, G * E)
    # block-diagonal ones: row e has ones on columns [e*I, (e+1)*I)
    eexp = jnp.asarray(np.kron(np.eye(E, dtype=np.float32),
                               np.ones((1, I), dtype=np.float32)))
    return [p["wgg"], p["bgg"], p["lno_g"], p["lno_b"],
            wge_cat, bge_cat, eexp,
            w1_cat.astype(jnp.bfloat16), b1_cat,
            w2_cat.astype(jnp.bfloat16), b2_stk,
            p["lng_g"], p["lng_b"]]


def mog_positionwise_ff(x, params):
    B, T, D = x.shape
    N = B * T
    x2d = x.reshape(N, D).astype(jnp.float32)

    # token tile: as large as possible (<= TM_MAX); pad N so no tail is dropped
    tm = min(TM_MAX, _round_up(N, 8))
    n_pad = _round_up(N, tm)
    if n_pad != N:
        x2d = jnp.pad(x2d, ((0, n_pad - N), (0, 0)))

    weights = _pack_params(params)

    # Weights are tiny (~0.3 MB) so full-resident constant-index blocks are fine;
    # the pipeline only DMAs them once (index never changes across the grid).
    def full_spec(a):
        nd = a.ndim
        return pl.BlockSpec(a.shape, lambda i, _nd=nd: (0,) * _nd)

    kernel = functools.partial(_mog_kernel,
                               mog_top_k=MOG_TOP_K, moe_top_k=MOE_TOP_K,
                               num_groups=NUM_GROUPS, num_experts=NUM_EXPERTS)

    out2d = pl.pallas_call(
        kernel,
        out_shape=jax.ShapeDtypeStruct((n_pad, D), jnp.float32),
        grid=(n_pad // tm,),
        in_specs=[pl.BlockSpec((tm, D), lambda i: (i, 0))]
                 + [full_spec(w) for w in weights],
        out_specs=pl.BlockSpec((tm, D), lambda i: (i, 0)),
        compiler_params=pltpu.CompilerParams(
            dimension_semantics=("parallel",)),
    )(x2d, *weights)

    return out2d[:N].reshape(B, T, D)


# ------------------------- pure-JAX reference ----------------------------
def mog_reference(x, p):
    B, T, D = x.shape
    x2d = x.reshape(B * T, D).astype(jnp.float32)
    g_logits = x2d @ p["wgg"] + p["bgg"]
    wg = _topk_dense_softmax(g_logits, MOG_TOP_K)
    z = _layernorm(x2d, p["lno_g"], p["lno_b"])
    acc = jnp.zeros_like(x2d)
    for g in range(NUM_GROUPS):
        e_logits = z @ p["wge"][g] + p["bge"][g]
        we = _topk_dense_softmax(e_logits, MOE_TOP_K)
        core = jnp.zeros_like(x2d)
        for e in range(NUM_EXPERTS):
            h = jnp.maximum(z @ p["w1"][g, e] + p["b1"][g, e], 0.0)
            core = core + we[:, e:e + 1] * (h @ p["w2"][g, e] + p["b2"][g, e])
        acc = acc + wg[:, g:g + 1] * _layernorm(z + core, p["lng_g"][g],
                                                p["lng_b"][g])
    return (x2d + acc).reshape(B, T, D)


# --------------------------------- main ----------------------------------
def _init_params(key):
    ks = jax.random.split(key, 8)
    s = 0.1
    return {
        "wgg":   s * jax.random.normal(ks[0], (HIDDEN, NUM_GROUPS), jnp.float32),
        "bgg":   s * jax.random.normal(ks[1], (1, NUM_GROUPS), jnp.float32),
        "lno_g": jnp.ones((1, HIDDEN), jnp.float32),
        "lno_b": jnp.zeros((1, HIDDEN), jnp.float32),
        "wge":   s * jax.random.normal(ks[2], (NUM_GROUPS, HIDDEN, NUM_EXPERTS), jnp.float32),
        "bge":   s * jax.random.normal(ks[3], (NUM_GROUPS, 1, NUM_EXPERTS), jnp.float32),
        "w1":    s * jax.random.normal(ks[4], (NUM_GROUPS, NUM_EXPERTS, HIDDEN, INNER), jnp.float32),
        "b1":    s * jax.random.normal(ks[5], (NUM_GROUPS, NUM_EXPERTS, 1, INNER), jnp.float32),
        "w2":    s * jax.random.normal(ks[6], (NUM_GROUPS, NUM_EXPERTS, INNER, HIDDEN), jnp.float32),
        "b2":    s * jax.random.normal(ks[7], (NUM_GROUPS, NUM_EXPERTS, 1, HIDDEN), jnp.float32),
        "lng_g": jnp.ones((NUM_GROUPS, 1, HIDDEN), jnp.float32),
        "lng_b": jnp.zeros((NUM_GROUPS, 1, HIDDEN), jnp.float32),
    }


if __name__ == "__main__":
    key = jax.random.PRNGKey(0)
    k_x, k_p, k_x2 = jax.random.split(key, 3)
    params = _init_params(k_p)

    # small shape implied by the module (batch=2, seq=8, hidden=32)
    x = jax.random.normal(k_x, (2, 8, HIDDEN), jnp.float32)
    out = jax.block_until_ready(mog_positionwise_ff(x, params))
    ref = jax.block_until_ready(mog_reference(x, params))
    assert out.shape == (2, 8, HIDDEN)
    np.testing.assert_allclose(np.asarray(out), np.asarray(ref),
                               rtol=2e-2, atol=2e-2)

    # second shape exercising the multi-tile grid + tail padding (N=900 -> 2x512 tiles)
    x2 = jax.random.normal(k_x2, (3, 300, HIDDEN), jnp.float32)
    out2 = jax.block_until_ready(mog_positionwise_ff(x2, params))
    ref2 = jax.block_until_ready(mog_reference(x2, params))
    assert out2.shape == (3, 300, HIDDEN)
    np.testing.assert_allclose(np.asarray(out2), np.asarray(ref2),
                               rtol=2e-2, atol=2e-2)

    print("KERNEL_OK")
</pallas_src>

<mosaic_0001>
module attributes {stable_mosaic.version = 11 : i64} {
  func.func @_mog_kernel(%arg0: i32, %arg1: memref<16x32xf32, #tpu.memory_space<vmem>>, %arg2: memref<32x4xf32, #tpu.memory_space<vmem>>, %arg3: memref<1x4xf32, #tpu.memory_space<vmem>>, %arg4: memref<1x32xf32, #tpu.memory_space<vmem>>, %arg5: memref<1x32xf32, #tpu.memory_space<vmem>>, %arg6: memref<32x16xf32, #tpu.memory_space<vmem>>, %arg7: memref<1x16xf32, #tpu.memory_space<vmem>>, %arg8: memref<4x256xf32, #tpu.memory_space<vmem>>, %arg9: memref<4x32x256xbf16, #tpu.memory_space<vmem>>, %arg10: memref<4x1x256xf32, #tpu.memory_space<vmem>>, %arg11: memref<4x256x32xbf16, #tpu.memory_space<vmem>>, %arg12: memref<4x4x32xf32, #tpu.memory_space<vmem>>, %arg13: memref<4x1x32xf32, #tpu.memory_space<vmem>>, %arg14: memref<4x1x32xf32, #tpu.memory_space<vmem>>, %arg15: memref<16x32xf32, #tpu.memory_space<vmem>>) attributes {dimension_semantics = [#tpu.dimension_semantics<parallel>], iteration_bounds = array<i64: 1>, scalar_prefetch = 0 : i64, scratch_operands = 0 : i64, tpu.core_type = #tpu.core_type<tc>, window_params = [{transform_indices = @transform_0, window_bounds = array<i64: 16, 32>}, {pipeline_mode = #tpu.pipeline_mode<synchronous>, transform_indices = @transform_1, window_bounds = array<i64: 32, 4>}, {pipeline_mode = #tpu.pipeline_mode<synchronous>, transform_indices = @transform_2, window_bounds = array<i64: 1, 4>}, {pipeline_mode = #tpu.pipeline_mode<synchronous>, transform_indices = @transform_3, window_bounds = array<i64: 1, 32>}, {pipeline_mode = #tpu.pipeline_mode<synchronous>, transform_indices = @transform_4, window_bounds = array<i64: 1, 32>}, {pipeline_mode = #tpu.pipeline_mode<synchronous>, transform_indices = @transform_5, window_bounds = array<i64: 32, 16>}, {pipeline_mode = #tpu.pipeline_mode<synchronous>, transform_indices = @transform_6, window_bounds = array<i64: 1, 16>}, {pipeline_mode = #tpu.pipeline_mode<synchronous>, transform_indices = @transform_7, window_bounds = array<i64: 4, 256>}, {pipeline_mode = #tpu.pipeline_mode<synchronous>, transform_indices = @transform_8, window_bounds = array<i64: 4, 32, 256>}, {pipeline_mode = #tpu.pipeline_mode<synchronous>, transform_indices = @transform_9, window_bounds = array<i64: 4, 1, 256>}, {pipeline_mode = #tpu.pipeline_mode<synchronous>, transform_indices = @transform_10, window_bounds = array<i64: 4, 256, 32>}, {pipeline_mode = #tpu.pipeline_mode<synchronous>, transform_indices = @transform_11, window_bounds = array<i64: 4, 4, 32>}, {pipeline_mode = #tpu.pipeline_mode<synchronous>, transform_indices = @transform_12, window_bounds = array<i64: 4, 1, 32>}, {pipeline_mode = #tpu.pipeline_mode<synchronous>, transform_indices = @transform_13, window_bounds = array<i64: 4, 1, 32>}, {transform_indices = @transform_14, window_bounds = array<i64: 16, 32>}]} {
    %c0 = arith.constant 0 : index
    %c0_0 = arith.constant 0 : index
    %0 = vector.load %arg1[%c0, %c0_0] : memref<16x32xf32, #tpu.memory_space<vmem>>, vector<16x32xf32>
    %c0_1 = arith.constant 0 : index
    %c0_2 = arith.constant 0 : index
    %1 = vector.load %arg2[%c0_1, %c0_2] : memref<32x4xf32, #tpu.memory_space<vmem>>, vector<32x4xf32>
    %cst = arith.constant dense<0.000000e+00> : vector<16x4xf32>
    %2 = tpu.matmul %0, %1, %cst {dimension_numbers = #tpu.dot_dimension_numbers<[1], [0], [0], [1], [0, 0, 1, 1], [], []>} : vector<16x32xf32>, vector<32x4xf32>, vector<16x4xf32> -> vector<16x4xf32>
    %c0_3 = arith.constant 0 : index
    %c0_4 = arith.constant 0 : index
    %3 = vector.load %arg3[%c0_3, %c0_4] : memref<1x4xf32, #tpu.memory_space<vmem>>, vector<1x4xf32>
    %4 = vector.broadcast %3 : vector<1x4xf32> to vector<16x4xf32>
    %5 = arith.addf %2, %4 : vector<16x4xf32>
    %cst_5 = arith.constant dense<0xFF800000> : vector<16xf32>
    %6 = vector.multi_reduction <maximumf>, %5, %cst_5 [1] : vector<16x4xf32> to vector<16xf32>
    %7 = vector.shape_cast %6 : vector<16xf32> to vector<16x1xf32>
    %8 = vector.broadcast %7 : vector<16x1xf32> to vector<16x4xf32>
    %9 = arith.cmpf oge, %5, %8 : vector<16x4xf32>
    %cst_6 = arith.constant -1.000000e+30 : f32
    %10 = vector.broadcast %cst_6 : f32 to vector<16x4xf32>
    %11 = arith.select %9, %10, %5 : vector<16x4xi1>, vector<16x4xf32>
    %cst_7 = arith.constant dense<0xFF800000> : vector<16xf32>
    %12 = vector.multi_reduction <maximumf>, %11, %cst_7 [1] : vector<16x4xf32> to vector<16xf32>
    %13 = vector.shape_cast %12 : vector<16xf32> to vector<16x1xf32>
    %14 = arith.subf %7, %7 : vector<16x1xf32>
    %15 = math.exp %14 : vector<16x1xf32>
    %16 = arith.subf %13, %7 : vector<16x1xf32>
    %17 = math.exp %16 : vector<16x1xf32>
    %18 = arith.addf %15, %17 : vector<16x1xf32>
    %cst_8 = arith.constant 0.000000e+00 : f32
    %19 = vector.broadcast %cst_8 : f32 to vector<16x4xf32>
    %20 = vector.broadcast %7 : vector<16x1xf32> to vector<16x4xf32>
    %21 = arith.cmpf oeq, %5, %20 : vector<16x4xf32>
    %22 = arith.divf %15, %18 : vector<16x1xf32>
    %23 = vector.shape_cast %22 : vector<16x1xf32> to vector<16x1xf32>
    %24 = vector.broadcast %23 : vector<16x1xf32> to vector<16x4xf32>
    %25 = arith.select %21, %24, %19 : vector<16x4xi1>, vector<16x4xf32>
    %26 = vector.broadcast %13 : vector<16x1xf32> to vector<16x4xf32>
    %27 = arith.cmpf oeq, %5, %26 : vector<16x4xf32>
    %28 = arith.divf %17, %18 : vector<16x1xf32>
    %29 = vector.shape_cast %28 : vector<16x1xf32> to vector<16x1xf32>
    %30 = vector.broadcast %29 : vector<16x1xf32> to vector<16x4xf32>
    %31 = arith.select %27, %30, %25 : vector<16x4xi1>, vector<16x4xf32>
    %c0_9 = arith.constant 0 : index
    %c0_10 = arith.constant 0 : index
    %32 = vector.load %arg4[%c0_9, %c0_10] : memref<1x32xf32, #tpu.memory_space<vmem>>, vector<1x32xf32>
    %c0_11 = arith.constant 0 : index
    %c0_12 = arith.constant 0 : index
    %33 = vector.load %arg5[%c0_11, %c0_12] : memref<1x32xf32, #tpu.memory_space<vmem>>, vector<1x32xf32>
    %cst_13 = arith.constant dense<0.000000e+00> : vector<16xf32>
    %34 = vector.multi_reduction <add>, %0, %cst_13 [1] : vector<16x32xf32> to vector<16xf32>
    %35 = vector.shape_cast %34 : vector<16xf32> to vector<16x1xf32>
    %cst_14 = arith.constant 3.200000e+01 : f32
    %36 = vector.broadcast %cst_14 : f32 to vector<16x1xf32>
    %37 = arith.divf %35, %36 : vector<16x1xf32>
    %38 = vector.broadcast %37 : vector<16x1xf32> to vector<16x32xf32>
    %39 = arith.subf %0, %38 : vector<16x32xf32>
    %40 = arith.mulf %39, %39 : vector<16x32xf32>
    %cst_15 = arith.constant dense<0.000000e+00> : vector<16xf32>
    %41 = vector.multi_reduction <add>, %40, %cst_15 [1] : vector<16x32xf32> to vector<16xf32>
    %42 = vector.shape_cast %41 : vector<16xf32> to vector<16x1xf32>
    %cst_16 = arith.constant 3.200000e+01 : f32
    %43 = vector.broadcast %cst_16 : f32 to vector<16x1xf32>
    %44 = arith.divf %42, %43 : vector<16x1xf32>
    %cst_17 = arith.constant 9.99999974E-6 : f32
    %45 = vector.broadcast %cst_17 : f32 to vector<16x1xf32>
    %46 = arith.addf %44, %45 : vector<16x1xf32>
    %47 = math.rsqrt %46 : vector<16x1xf32>
    %48 = vector.broadcast %47 : vector<16x1xf32> to vector<16x32xf32>
    %49 = arith.mulf %39, %48 : vector<16x32xf32>
    %50 = vector.broadcast %32 : vector<1x32xf32> to vector<16x32xf32>
    %51 = arith.mulf %49, %50 : vector<16x32xf32>
    %52 = vector.broadcast %33 : vector<1x32xf32> to vector<16x32xf32>
    %53 = arith.addf %51, %52 : vector<16x32xf32>
    %54 = arith.truncf %53 : vector<16x32xf32> to vector<16x32xbf16>
    %c0_18 = arith.constant 0 : index
    %c0_19 = arith.constant 0 : index
    %55 = vector.load %arg6[%c0_18, %c0_19] : memref<32x16xf32, #tpu.memory_space<vmem>>, vector<32x16xf32>
    %cst_20 = arith.constant dense<0.000000e+00> : vector<16x16xf32>
    %56 = tpu.matmul %53, %55, %cst_20 {dimension_numbers = #tpu.dot_dimension_numbers<[1], [0], [0], [1], [0, 0, 1, 1], [], []>} : vector<16x32xf32>, vector<32x16xf32>, vector<16x16xf32> -> vector<16x16xf32>
    %c0_21 = arith.constant 0 : index
    %c0_22 = arith.constant 0 : index
    %57 = vector.load %arg7[%c0_21, %c0_22] : memref<1x16xf32, #tpu.memory_space<vmem>>, vector<1x16xf32>
    %58 = vector.broadcast %57 : vector<1x16xf32> to vector<16x16xf32>
    %59 = arith.addf %56, %58 : vector<16x16xf32>
    %cst_23 = arith.constant 0.000000e+00 : f32
    %60 = vector.broadcast %cst_23 : f32 to vector<16x32xf32>
    %61 = vector.extract_strided_slice %59 {offsets = [0, 0], sizes = [16, 4], strides = [1, 1]} : vector<16x16xf32> to vector<16x4xf32>
    %cst_24 = arith.constant dense<0xFF800000> : vector<16xf32>
    %62 = vector.multi_reduction <maximumf>, %61, %cst_24 [1] : vector<16x4xf32> to vector<16xf32>
    %63 = vector.shape_cast %62 : vector<16xf32> to vector<16x1xf32>
    %64 = vector.broadcast %63 : vector<16x1xf32> to vector<16x4xf32>
    %65 = arith.cmpf oge, %61, %64 : vector<16x4xf32>
    %cst_25 = arith.constant -1.000000e+30 : f32
    %66 = vector.broadcast %cst_25 : f32 to vector<16x4xf32>
    %67 = arith.select %65, %66, %61 : vector<16x4xi1>, vector<16x4xf32>
    %cst_26 = arith.constant dense<0xFF800000> : vector<16xf32>
    %68 = vector.multi_reduction <maximumf>, %67, %cst_26 [1] : vector<16x4xf32> to vector<16xf32>
    %69 = vector.shape_cast %68 : vector<16xf32> to vector<16x1xf32>
    %70 = arith.subf %63, %63 : vector<16x1xf32>
    %71 = math.exp %70 : vector<16x1xf32>
    %72 = arith.subf %69, %63 : vector<16x1xf32>
    %73 = math.exp %72 : vector<16x1xf32>
    %74 = arith.addf %71, %73 : vector<16x1xf32>
    %cst_27 = arith.constant 0.000000e+00 : f32
    %75 = vector.broadcast %cst_27 : f32 to vector<16x4xf32>
    %76 = vector.broadcast %63 : vector<16x1xf32> to vector<16x4xf32>
    %77 = arith.cmpf oeq, %61, %76 : vector<16x4xf32>
    %78 = arith.divf %71, %74 : vector<16x1xf32>
    %79 = vector.shape_cast %78 : vector<16x1xf32> to vector<16x1xf32>
    %80 = vector.broadcast %79 : vector<16x1xf32> to vector<16x4xf32>
    %81 = arith.select %77, %80, %75 : vector<16x4xi1>, vector<16x4xf32>
    %82 = vector.broadcast %69 : vector<16x1xf32> to vector<16x4xf32>
    %83 = arith.cmpf oeq, %61, %82 : vector<16x4xf32>
    %84 = arith.divf %73, %74 : vector<16x1xf32>
    %85 = vector.shape_cast %84 : vector<16x1xf32> to vector<16x1xf32>
    %86 = vector.broadcast %85 : vector<16x1xf32> to vector<16x4xf32>
    %87 = arith.select %83, %86, %81 : vector<16x4xi1>, vector<16x4xf32>
    %c0_28 = arith.constant 0 : index
    %c0_29 = arith.constant 0 : index
    %c0_30 = arith.constant 0 : index
    %88 = vector.load %arg9[%c0_28, %c0_29, %c0_30] : memref<4x32x256xbf16, #tpu.memory_space<vmem>>, vector<1x32x256xbf16>
    %89 = vector.shape_cast %88 : vector<1x32x256xbf16> to vector<32x256xbf16>
    %cst_31 = arith.constant dense<0.000000e+00> : vector<16x256xf32>
    %90 = tpu.matmul %54, %89, %cst_31 {dimension_numbers = #tpu.dot_dimension_numbers<[1], [0], [0], [1], [0, 0, 1, 1], [], []>} : vector<16x32xbf16>, vector<32x256xbf16>, vector<16x256xf32> -> vector<16x256xf32>
    %c0_32 = arith.constant 0 : index
    %c0_33 = arith.constant 0 : index
    %c0_34 = arith.constant 0 : index
    %91 = vector.load %arg10[%c0_32, %c0_33, %c0_34] : memref<4x1x256xf32, #tpu.memory_space<vmem>>, vector<1x1x256xf32>
    %92 = vector.shape_cast %91 : vector<1x1x256xf32> to vector<1x256xf32>
    %93 = vector.broadcast %92 : vector<1x256xf32> to vector<16x256xf32>
    %94 = arith.addf %90, %93 : vector<16x256xf32>
    %cst_35 = arith.constant 0.000000e+00 : f32
    %95 = vector.broadcast %cst_35 : f32 to vector<16x256xf32>
    %96 = arith.maximumf %94, %95 : vector<16x256xf32>
    %c0_36 = arith.constant 0 : index
    %c0_37 = arith.constant 0 : index
    %97 = vector.load %arg8[%c0_36, %c0_37] : memref<4x256xf32, #tpu.memory_space<vmem>>, vector<4x256xf32>
    %cst_38 = arith.constant dense<0.000000e+00> : vector<16x256xf32>
    %98 = tpu.matmul %87, %97, %cst_38 {dimension_numbers = #tpu.dot_dimension_numbers<[1], [0], [0], [1], [0, 0, 1, 1], [], []>} : vector<16x4xf32>, vector<4x256xf32>, vector<16x256xf32> -> vector<16x256xf32>
    %99 = arith.mulf %96, %98 : vector<16x256xf32>
    %100 = arith.truncf %99 : vector<16x256xf32> to vector<16x256xbf16>
    %c0_39 = arith.constant 0 : index
    %c0_40 = arith.constant 0 : index
    %c0_41 = arith.constant 0 : index
    %101 = vector.load %arg11[%c0_39, %c0_40, %c0_41] : memref<4x256x32xbf16, #tpu.memory_space<vmem>>, vector<1x256x32xbf16>
    %102 = vector.shape_cast %101 : vector<1x256x32xbf16> to vector<256x32xbf16>
    %cst_42 = arith.constant dense<0.000000e+00> : vector<16x32xf32>
    %103 = tpu.matmul %100, %102, %cst_42 {dimension_numbers = #tpu.dot_dimension_numbers<[1], [0], [0], [1], [0, 0, 1, 1], [], []>} : vector<16x256xbf16>, vector<256x32xbf16>, vector<16x32xf32> -> vector<16x32xf32>
    %c0_43 = arith.constant 0 : index
    %c0_44 = arith.constant 0 : index
    %c0_45 = arith.constant 0 : index
    %104 = vector.load %arg12[%c0_43, %c0_44, %c0_45] : memref<4x4x32xf32, #tpu.memory_space<vmem>>, vector<1x4x32xf32>
    %105 = vector.shape_cast %104 : vector<1x4x32xf32> to vector<4x32xf32>
    %cst_46 = arith.constant dense<0.000000e+00> : vector<16x32xf32>
    %106 = tpu.matmul %87, %105, %cst_46 {dimension_numbers = #tpu.dot_dimension_numbers<[1], [0], [0], [1], [0, 0, 1, 1], [], []>} : vector<16x4xf32>, vector<4x32xf32>, vector<16x32xf32> -> vector<16x32xf32>
    %107 = arith.addf %103, %106 : vector<16x32xf32>
    %108 = arith.addf %53, %107 : vector<16x32xf32>
    %c0_47 = arith.constant 0 : index
    %c0_48 = arith.constant 0 : index
    %c0_49 = arith.constant 0 : index
    %109 = vector.load %arg13[%c0_47, %c0_48, %c0_49] : memref<4x1x32xf32, #tpu.memory_space<vmem>>, vector<1x1x32xf32>
    %110 = vector.shape_cast %109 : vector<1x1x32xf32> to vector<1x32xf32>
    %c0_50 = arith.constant 0 : index
    %c0_51 = arith.constant 0 : index
    %c0_52 = arith.constant 0 : index
    %111 = vector.load %arg14[%c0_50, %c0_51, %c0_52] : memref<4x1x32xf32, #tpu.memory_space<vmem>>, vector<1x1x32xf32>
    %112 = vector.shape_cast %111 : vector<1x1x32xf32> to vector<1x32xf32>
    %cst_53 = arith.constant dense<0.000000e+00> : vector<16xf32>
    %113 = vector.multi_reduction <add>, %108, %cst_53 [1] : vector<16x32xf32> to vector<16xf32>
    %114 = vector.shape_cast %113 : vector<16xf32> to vector<16x1xf32>
    %cst_54 = arith.constant 3.200000e+01 : f32
    %115 = vector.broadcast %cst_54 : f32 to vector<16x1xf32>
    %116 = arith.divf %114, %115 : vector<16x1xf32>
    %117 = vector.broadcast %116 : vector<16x1xf32> to vector<16x32xf32>
    %118 = arith.subf %108, %117 : vector<16x32xf32>
    %119 = arith.mulf %118, %118 : vector<16x32xf32>
    %cst_55 = arith.constant dense<0.000000e+00> : vector<16xf32>
    %120 = vector.multi_reduction <add>, %119, %cst_55 [1] : vector<16x32xf32> to vector<16xf32>
    %121 = vector.shape_cast %120 : vector<16xf32> to vector<16x1xf32>
    %cst_56 = arith.constant 3.200000e+01 : f32
    %122 = vector.broadcast %cst_56 : f32 to vector<16x1xf32>
    %123 = arith.divf %121, %122 : vector<16x1xf32>
    %cst_57 = arith.constant 9.99999974E-6 : f32
    %124 = vector.broadcast %cst_57 : f32 to vector<16x1xf32>
    %125 = arith.addf %123, %124 : vector<16x1xf32>
    %126 = math.rsqrt %125 : vector<16x1xf32>
    %127 = vector.broadcast %126 : vector<16x1xf32> to vector<16x32xf32>
    %128 = arith.mulf %118, %127 : vector<16x32xf32>
    %129 = vector.broadcast %110 : vector<1x32xf32> to vector<16x32xf32>
    %130 = arith.mulf %128, %129 : vector<16x32xf32>
    %131 = vector.broadcast %112 : vector<1x32xf32> to vector<16x32xf32>
    %132 = arith.addf %130, %131 : vector<16x32xf32>
    %133 = vector.extract_strided_slice %31 {offsets = [0, 0], sizes = [16, 1], strides = [1, 1]} : vector<16x4xf32> to vector<16x1xf32>
    %134 = vector.broadcast %133 : vector<16x1xf32> to vector<16x32xf32>
    %135 = arith.mulf %134, %132 : vector<16x32xf32>
    %136 = arith.addf %60, %135 : vector<16x32xf32>
    %137 = vector.extract_strided_slice %59 {offsets = [0, 4], sizes = [16, 4], strides = [1, 1]} : vector<16x16xf32> to vector<16x4xf32>
    %cst_58 = arith.constant dense<0xFF800000> : vector<16xf32>
    %138 = vector.multi_reduction <maximumf>, %137, %cst_58 [1] : vector<16x4xf32> to vector<16xf32>
    %139 = vector.shape_cast %138 : vector<16xf32> to vector<16x1xf32>
    %140 = vector.broadcast %139 : vector<16x1xf32> to vector<16x4xf32>
    %141 = arith.cmpf oge, %137, %140 : vector<16x4xf32>
    %cst_59 = arith.constant -1.000000e+30 : f32
    %142 = vector.broadcast %cst_59 : f32 to vector<16x4xf32>
    %143 = arith.select %141, %142, %137 : vector<16x4xi1>, vector<16x4xf32>
    %cst_60 = arith.constant dense<0xFF800000> : vector<16xf32>
    %144 = vector.multi_reduction <maximumf>, %143, %cst_60 [1] : vector<16x4xf32> to vector<16xf32>
    %145 = vector.shape_cast %144 : vector<16xf32> to vector<16x1xf32>
    %146 = arith.subf %139, %139 : vector<16x1xf32>
    %147 = math.exp %146 : vector<16x1xf32>
    %148 = arith.subf %145, %139 : vector<16x1xf32>
    %149 = math.exp %148 : vector<16x1xf32>
    %150 = arith.addf %147, %149 : vector<16x1xf32>
    %cst_61 = arith.constant 0.000000e+00 : f32
    %151 = vector.broadcast %cst_61 : f32 to vector<16x4xf32>
    %152 = vector.broadcast %139 : vector<16x1xf32> to vector<16x4xf32>
    %153 = arith.cmpf oeq, %137, %152 : vector<16x4xf32>
    %154 = arith.divf %147, %150 : vector<16x1xf32>
    %155 = vector.shape_cast %154 : vector<16x1xf32> to vector<16x1xf32>
    %156 = vector.broadcast %155 : vector<16x1xf32> to vector<16x4xf32>
    %157 = arith.select %153, %156, %151 : vector<16x4xi1>, vector<16x4xf32>
    %158 = vector.broadcast %145 : vector<16x1xf32> to vector<16x4xf32>
    %159 = arith.cmpf oeq, %137, %158 : vector<16x4xf32>
    %160 = arith.divf %149, %150 : vector<16x1xf32>
    %161 = vector.shape_cast %160 : vector<16x1xf32> to vector<16x1xf32>
    %162 = vector.broadcast %161 : vector<16x1xf32> to vector<16x4xf32>
    %163 = arith.select %159, %162, %157 : vector<16x4xi1>, vector<16x4xf32>
    %c1 = arith.constant 1 : index
    %c0_62 = arith.constant 0 : index
    %c0_63 = arith.constant 0 : index
    %164 = vector.load %arg9[%c1, %c0_62, %c0_63] : memref<4x32x256xbf16, #tpu.memory_space<vmem>>, vector<1x32x256xbf16>
    %165 = vector.shape_cast %164 : vector<1x32x256xbf16> to vector<32x256xbf16>
    %cst_64 = arith.constant dense<0.000000e+00> : vector<16x256xf32>
    %166 = tpu.matmul %54, %165, %cst_64 {dimension_numbers = #tpu.dot_dimension_numbers<[1], [0], [0], [1], [0, 0, 1, 1], [], []>} : vector<16x32xbf16>, vector<32x256xbf16>, vector<16x256xf32> -> vector<16x256xf32>
    %c1_65 = arith.constant 1 : index
    %c0_66 = arith.constant 0 : index
    %c0_67 = arith.constant 0 : index
    %167 = vector.load %arg10[%c1_65, %c0_66, %c0_67] : memref<4x1x256xf32, #tpu.memory_space<vmem>>, vector<1x1x256xf32>
    %168 = vector.shape_cast %167 : vector<1x1x256xf32> to vector<1x256xf32>
    %169 = vector.broadcast %168 : vector<1x256xf32> to vector<16x256xf32>
    %170 = arith.addf %166, %169 : vector<16x256xf32>
    %cst_68 = arith.constant 0.000000e+00 : f32
    %171 = vector.broadcast %cst_68 : f32 to vector<16x256xf32>
    %172 = arith.maximumf %170, %171 : vector<16x256xf32>
    %c0_69 = arith.constant 0 : index
    %c0_70 = arith.constant 0 : index
    %173 = vector.load %arg8[%c0_69, %c0_70] : memref<4x256xf32, #tpu.memory_space<vmem>>, vector<4x256xf32>
    %cst_71 = arith.constant dense<0.000000e+00> : vector<16x256xf32>
    %174 = tpu.matmul %163, %173, %cst_71 {dimension_numbers = #tpu.dot_dimension_numbers<[1], [0], [0], [1], [0, 0, 1, 1], [], []>} : vector<16x4xf32>, vector<4x256xf32>, vector<16x256xf32> -> vector<16x256xf32>
    %175 = arith.mulf %172, %174 : vector<16x256xf32>
    %176 = arith.truncf %175 : vector<16x256xf32> to vector<16x256xbf16>
    %c1_72 = arith.constant 1 : index
    %c0_73 = arith.constant 0 : index
    %c0_74 = arith.constant 0 : index
    %177 = vector.load %arg11[%c1_72, %c0_73, %c0_74] : memref<4x256x32xbf16, #tpu.memory_space<vmem>>, vector<1x256x32xbf16>
    %178 = vector.shape_cast %177 : vector<1x256x32xbf16> to vector<256x32xbf16>
    %cst_75 = arith.constant dense<0.000000e+00> : vector<16x32xf32>
    %179 = tpu.matmul %176, %178, %cst_75 {dimension_numbers = #tpu.dot_dimension_numbers<[1], [0], [0], [1], [0, 0, 1, 1], [], []>} : vector<16x256xbf16>, vector<256x32xbf16>, vector<16x32xf32> -> vector<16x32xf32>
    %c1_76 = arith.constant 1 : index
    %c0_77 = arith.constant 0 : index
    %c0_78 = arith.constant 0 : index
    %180 = vector.load %arg12[%c1_76, %c0_77, %c0_78] : memref<4x4x32xf32, #tpu.memory_space<vmem>>, vector<1x4x32xf32>
    %181 = vector.shape_cast %180 : vector<1x4x32xf32> to vector<4x32xf32>
    %cst_79 = arith.constant dense<0.000000e+00> : vector<16x32xf32>
    %182 = tpu.matmul %163, %181, %cst_79 {dimension_numbers = #tpu.dot_dimension_numbers<[1], [0], [0], [1], [0, 0, 1, 1], [], []>} : vector<16x4xf32>, vector<4x32xf32>, vector<16x32xf32> -> vector<16x32xf32>
    %183 = arith.addf %179, %182 : vector<16x32xf32>
    %184 = arith.addf %53, %183 : vector<16x32xf32>
    %c1_80 = arith.constant 1 : index
    %c0_81 = arith.constant 0 : index
    %c0_82 = arith.constant 0 : index
    %185 = vector.load %arg13[%c1_80, %c0_81, %c0_82] : memref<4x1x32xf32, #tpu.memory_space<vmem>>, vector<1x1x32xf32>
    %186 = vector.shape_cast %185 : vector<1x1x32xf32> to vector<1x32xf32>
    %c1_83 = arith.constant 1 : index
    %c0_84 = arith.constant 0 : index
    %c0_85 = arith.constant 0 : index
    %187 = vector.load %arg14[%c1_83, %c0_84, %c0_85] : memref<4x1x32xf32, #tpu.memory_space<vmem>>, vector<1x1x32xf32>
    %188 = vector.shape_cast %187 : vector<1x1x32xf32> to vector<1x32xf32>
    %cst_86 = arith.constant dense<0.000000e+00> : vector<16xf32>
    %189 = vector.multi_reduction <add>, %184, %cst_86 [1] : vector<16x32xf32> to vector<16xf32>
    %190 = vector.shape_cast %189 : vector<16xf32> to vector<16x1xf32>
    %cst_87 = arith.constant 3.200000e+01 : f32
    %191 = vector.broadcast %cst_87 : f32 to vector<16x1xf32>
    %192 = arith.divf %190, %191 : vector<16x1xf32>
    %193 = vector.broadcast %192 : vector<16x1xf32> to vector<16x32xf32>
    %194 = arith.subf %184, %193 : vector<16x32xf32>
    %195 = arith.mulf %194, %194 : vector<16x32xf32>
    %cst_88 = arith.constant dense<0.000000e+00> : vector<16xf32>
    %196 = vector.multi_reduction <add>, %195, %cst_88 [1] : vector<16x32xf32> to vector<16xf32>
    %197 = vector.shape_cast %196 : vector<16xf32> to vector<16x1xf32>
    %cst_89 = arith.constant 3.200000e+01 : f32
    %198 = vector.broadcast %cst_89 : f32 to vector<16x1xf32>
    %199 = arith.divf %197, %198 : vector<16x1xf32>
    %cst_90 = arith.constant 9.99999974E-6 : f32
    %200 = vector.broadcast %cst_90 : f32 to vector<16x1xf32>
    %201 = arith.addf %199, %200 : vector<16x1xf32>
    %202 = math.rsqrt %201 : vector<16x1xf32>
    %203 = vector.broadcast %202 : vector<16x1xf32> to vector<16x32xf32>
    %204 = arith.mulf %194, %203 : vector<16x32xf32>
    %205 = vector.broadcast %186 : vector<1x32xf32> to vector<16x32xf32>
    %206 = arith.mulf %204, %205 : vector<16x32xf32>
    %207 = vector.broadcast %188 : vector<1x32xf32> to vector<16x32xf32>
    %208 = arith.addf %206, %207 : vector<16x32xf32>
    %209 = vector.extract_strided_slice %31 {offsets = [0, 1], sizes = [16, 1], strides = [1, 1]} : vector<16x4xf32> to vector<16x1xf32>
    %210 = vector.broadcast %209 : vector<16x1xf32> to vector<16x32xf32>
    %211 = arith.mulf %210, %208 : vector<16x32xf32>
    %212 = arith.addf %136, %211 : vector<16x32xf32>
    %213 = vector.extract_strided_slice %59 {offsets = [0, 8], sizes = [16, 4], strides = [1, 1]} : vector<16x16xf32> to vector<16x4xf32>
    %cst_91 = arith.constant dense<0xFF800000> : vector<16xf32>
    %214 = vector.multi_reduction <maximumf>, %213, %cst_91 [1] : vector<16x4xf32> to vector<16xf32>
    %215 = vector.shape_cast %214 : vector<16xf32> to vector<16x1xf32>
    %216 = vector.broadcast %215 : vector<16x1xf32> to vector<16x4xf32>
    %217 = arith.cmpf oge, %213, %216 : vector<16x4xf32>
    %cst_92 = arith.constant -1.000000e+30 : f32
    %218 = vector.broadcast %cst_92 : f32 to vector<16x4xf32>
    %219 = arith.select %217, %218, %213 : vector<16x4xi1>, vector<16x4xf32>
    %cst_93 = arith.constant dense<0xFF800000> : vector<16xf32>
    %220 = vector.multi_reduction <maximumf>, %219, %cst_93 [1] : vector<16x4xf32> to vector<16xf32>
    %221 = vector.shape_cast %220 : vector<16xf32> to vector<16x1xf32>
    %222 = arith.subf %215, %215 : vector<16x1xf32>
    %223 = math.exp %222 : vector<16x1xf32>
    %224 = arith.subf %221, %215 : vector<16x1xf32>
    %225 = math.exp %224 : vector<16x1xf32>
    %226 = arith.addf %223, %225 : vector<16x1xf32>
    %cst_94 = arith.constant 0.000000e+00 : f32
    %227 = vector.broadcast %cst_94 : f32 to vector<16x4xf32>
    %228 = vector.broadcast %215 : vector<16x1xf32> to vector<16x4xf32>
    %229 = arith.cmpf oeq, %213, %228 : vector<16x4xf32>
    %230 = arith.divf %223, %226 : vector<16x1xf32>
    %231 = vector.shape_cast %230 : vector<16x1xf32> to vector<16x1xf32>
    %232 = vector.broadcast %231 : vector<16x1xf32> to vector<16x4xf32>
    %233 = arith.select %229, %232, %227 : vector<16x4xi1>, vector<16x4xf32>
    %234 = vector.broadcast %221 : vector<16x1xf32> to vector<16x4xf32>
    %235 = arith.cmpf oeq, %213, %234 : vector<16x4xf32>
    %236 = arith.divf %225, %226 : vector<16x1xf32>
    %237 = vector.shape_cast %236 : vector<16x1xf32> to vector<16x1xf32>
    %238 = vector.broadcast %237 : vector<16x1xf32> to vector<16x4xf32>
    %239 = arith.select %235, %238, %233 : vector<16x4xi1>, vector<16x4xf32>
    %c2 = arith.constant 2 : index
    %c0_95 = arith.constant 0 : index
    %c0_96 = arith.constant 0 : index
    %240 = vector.load %arg9[%c2, %c0_95, %c0_96] : memref<4x32x256xbf16, #tpu.memory_space<vmem>>, vector<1x32x256xbf16>
    %241 = vector.shape_cast %240 : vector<1x32x256xbf16> to vector<32x256xbf16>
    %cst_97 = arith.constant dense<0.000000e+00> : vector<16x256xf32>
    %242 = tpu.matmul %54, %241, %cst_97 {dimension_numbers = #tpu.dot_dimension_numbers<[1], [0], [0], [1], [0, 0, 1, 1], [], []>} : vector<16x32xbf16>, vector<32x256xbf16>, vector<16x256xf32> -> vector<16x256xf32>
    %c2_98 = arith.constant 2 : index
    %c0_99 = arith.constant 0 : index
    %c0_100 = arith.constant 0 : index
    %243 = vector.load %arg10[%c2_98, %c0_99, %c0_100] : memref<4x1x256xf32, #tpu.memory_space<vmem>>, vector<1x1x256xf32>
    %244 = vector.shape_cast %243 : vector<1x1x256xf32> to vector<1x256xf32>
    %245 = vector.broadcast %244 : vector<1x256xf32> to vector<16x256xf32>
    %246 = arith.addf %242, %245 : vector<16x256xf32>
    %cst_101 = arith.constant 0.000000e+00 : f32
    %247 = vector.broadcast %cst_101 : f32 to vector<16x256xf32>
    %248 = arith.maximumf %246, %247 : vector<16x256xf32>
    %c0_102 = arith.constant 0 : index
    %c0_103 = arith.constant 0 : index
    %249 = vector.load %arg8[%c0_102, %c0_103] : memref<4x256xf32, #tpu.memory_space<vmem>>, vector<4x256xf32>
    %cst_104 = arith.constant dense<0.000000e+00> : vector<16x256xf32>
    %250 = tpu.matmul %239, %249, %cst_104 {dimension_numbers = #tpu.dot_dimension_numbers<[1], [0], [0], [1], [0, 0, 1, 1], [], []>} : vector<16x4xf32>, vector<4x256xf32>, vector<16x256xf32> -> vector<16x256xf32>
    %251 = arith.mulf %248, %250 : vector<16x256xf32>
    %252 = arith.truncf %251 : vector<16x256xf32> to vector<16x256xbf16>
    %c2_105 = arith.constant 2 : index
    %c0_106 = arith.constant 0 : index
    %c0_107 = arith.constant 0 : index
    %253 = vector.load %arg11[%c2_105, %c0_106, %c0_107] : memref<4x256x32xbf16, #tpu.memory_space<vmem>>, vector<1x256x32xbf16>
    %254 = vector.shape_cast %253 : vector<1x256x32xbf16> to vector<256x32xbf16>
    %cst_108 = arith.constant dense<0.000000e+00> : vector<16x32xf32>
    %255 = tpu.matmul %252, %254, %cst_108 {dimension_numbers = #tpu.dot_dimension_numbers<[1], [0], [0], [1], [0, 0, 1, 1], [], []>} : vector<16x256xbf16>, vector<256x32xbf16>, vector<16x32xf32> -> vector<16x32xf32>
    %c2_109 = arith.constant 2 : index
    %c0_110 = arith.constant 0 : index
    %c0_111 = arith.constant 0 : index
    %256 = vector.load %arg12[%c2_109, %c0_110, %c0_111] : memref<4x4x32xf32, #tpu.memory_space<vmem>>, vector<1x4x32xf32>
    %257 = vector.shape_cast %256 : vector<1x4x32xf32> to vector<4x32xf32>
    %cst_112 = arith.constant dense<0.000000e+00> : vector<16x32xf32>
    %258 = tpu.matmul %239, %257, %cst_112 {dimension_numbers = #tpu.dot_dimension_numbers<[1], [0], [0], [1], [0, 0, 1, 1], [], []>} : vector<16x4xf32>, vector<4x32xf32>, vector<16x32xf32> -> vector<16x32xf32>
    %259 = arith.addf %255, %258 : vector<16x32xf32>
    %260 = arith.addf %53, %259 : vector<16x32xf32>
    %c2_113 = arith.constant 2 : index
    %c0_114 = arith.constant 0 : index
    %c0_115 = arith.constant 0 : index
    %261 = vector.load %arg13[%c2_113, %c0_114, %c0_115] : memref<4x1x32xf32, #tpu.memory_space<vmem>>, vector<1x1x32xf32>
    %262 = vector.shape_cast %261 : vector<1x1x32xf32> to vector<1x32xf32>
    %c2_116 = arith.constant 2 : index
    %c0_117 = arith.constant 0 : index
    %c0_118 = arith.constant 0 : index
    %263 = vector.load %arg14[%c2_116, %c0_117, %c0_118] : memref<4x1x32xf32, #tpu.memory_space<vmem>>, vector<1x1x32xf32>
    %264 = vector.shape_cast %263 : vector<1x1x32xf32> to vector<1x32xf32>
    %cst_119 = arith.constant dense<0.000000e+00> : vector<16xf32>
    %265 = vector.multi_reduction <add>, %260, %cst_119 [1] : vector<16x32xf32> to vector<16xf32>
    %266 = vector.shape_cast %265 : vector<16xf32> to vector<16x1xf32>
    %cst_120 = arith.constant 3.200000e+01 : f32
    %267 = vector.broadcast %cst_120 : f32 to vector<16x1xf32>
    %268 = arith.divf %266, %267 : vector<16x1xf32>
    %269 = vector.broadcast %268 : vector<16x1xf32> to vector<16x32xf32>
    %270 = arith.subf %260, %269 : vector<16x32xf32>
    %271 = arith.mulf %270, %270 : vector<16x32xf32>
    %cst_121 = arith.constant dense<0.000000e+00> : vector<16xf32>
    %272 = vector.multi_reduction <add>, %271, %cst_121 [1] : vector<16x32xf32> to vector<16xf32>
    %273 = vector.shape_cast %272 : vector<16xf32> to vector<16x1xf32>
    %cst_122 = arith.constant 3.200000e+01 : f32
    %274 = vector.broadcast %cst_122 : f32 to vector<16x1xf32>
    %275 = arith.divf %273, %274 : vector<16x1xf32>
    %cst_123 = arith.constant 9.99999974E-6 : f32
    %276 = vector.broadcast %cst_123 : f32 to vector<16x1xf32>
    %277 = arith.addf %275, %276 : vector<16x1xf32>
    %278 = math.rsqrt %277 : vector<16x1xf32>
    %279 = vector.broadcast %278 : vector<16x1xf32> to vector<16x32xf32>
    %280 = arith.mulf %270, %279 : vector<16x32xf32>
    %281 = vector.broadcast %262 : vector<1x32xf32> to vector<16x32xf32>
    %282 = arith.mulf %280, %281 : vector<16x32xf32>
    %283 = vector.broadcast %264 : vector<1x32xf32> to vector<16x32xf32>
    %284 = arith.addf %282, %283 : vector<16x32xf32>
    %285 = vector.extract_strided_slice %31 {offsets = [0, 2], sizes = [16, 1], strides = [1, 1]} : vector<16x4xf32> to vector<16x1xf32>
    %286 = vector.broadcast %285 : vector<16x1xf32> to vector<16x32xf32>
    %287 = arith.mulf %286, %284 : vector<16x32xf32>
    %288 = arith.addf %212, %287 : vector<16x32xf32>
    %289 = vector.extract_strided_slice %59 {offsets = [0, 12], sizes = [16, 4], strides = [1, 1]} : vector<16x16xf32> to vector<16x4xf32>
    %cst_124 = arith.constant dense<0xFF800000> : vector<16xf32>
    %290 = vector.multi_reduction <maximumf>, %289, %cst_124 [1] : vector<16x4xf32> to vector<16xf32>
    %291 = vector.shape_cast %290 : vector<16xf32> to vector<16x1xf32>
    %292 = vector.broadcast %291 : vector<16x1xf32> to vector<16x4xf32>
    %293 = arith.cmpf oge, %289, %292 : vector<16x4xf32>
    %cst_125 = arith.constant -1.000000e+30 : f32
    %294 = vector.broadcast %cst_125 : f32 to vector<16x4xf32>
    %295 = arith.select %293, %294, %289 : vector<16x4xi1>, vector<16x4xf32>
    %cst_126 = arith.constant dense<0xFF800000> : vector<16xf32>
    %296 = vector.multi_reduction <maximumf>, %295, %cst_126 [1] : vector<16x4xf32> to vector<16xf32>
    %297 = vector.shape_cast %296 : vector<16xf32> to vector<16x1xf32>
    %298 = arith.subf %291, %291 : vector<16x1xf32>
    %299 = math.exp %298 : vector<16x1xf32>
    %300 = arith.subf %297, %291 : vector<16x1xf32>
    %301 = math.exp %300 : vector<16x1xf32>
    %302 = arith.addf %299, %301 : vector<16x1xf32>
    %cst_127 = arith.constant 0.000000e+00 : f32
    %303 = vector.broadcast %cst_127 : f32 to vector<16x4xf32>
    %304 = vector.broadcast %291 : vector<16x1xf32> to vector<16x4xf32>
    %305 = arith.cmpf oeq, %289, %304 : vector<16x4xf32>
    %306 = arith.divf %299, %302 : vector<16x1xf32>
    %307 = vector.shape_cast %306 : vector<16x1xf32> to vector<16x1xf32>
    %308 = vector.broadcast %307 : vector<16x1xf32> to vector<16x4xf32>
    %309 = arith.select %305, %308, %303 : vector<16x4xi1>, vector<16x4xf32>
    %310 = vector.broadcast %297 : vector<16x1xf32> to vector<16x4xf32>
    %311 = arith.cmpf oeq, %289, %310 : vector<16x4xf32>
    %312 = arith.divf %301, %302 : vector<16x1xf32>
    %313 = vector.shape_cast %312 : vector<16x1xf32> to vector<16x1xf32>
    %314 = vector.broadcast %313 : vector<16x1xf32> to vector<16x4xf32>
    %315 = arith.select %311, %314, %309 : vector<16x4xi1>, vector<16x4xf32>
    %c3 = arith.constant 3 : index
    %c0_128 = arith.constant 0 : index
    %c0_129 = arith.constant 0 : index
    %316 = vector.load %arg9[%c3, %c0_128, %c0_129] : memref<4x32x256xbf16, #tpu.memory_space<vmem>>, vector<1x32x256xbf16>
    %317 = vector.shape_cast %316 : vector<1x32x256xbf16> to vector<32x256xbf16>
    %cst_130 = arith.constant dense<0.000000e+00> : vector<16x256xf32>
    %318 = tpu.matmul %54, %317, %cst_130 {dimension_numbers = #tpu.dot_dimension_numbers<[1], [0], [0], [1], [0, 0, 1, 1], [], []>} : vector<16x32xbf16>, vector<32x256xbf16>, vector<16x256xf32> -> vector<16x256xf32>
    %c3_131 = arith.constant 3 : index
    %c0_132 = arith.constant 0 : index
    %c0_133 = arith.constant 0 : index
    %319 = vector.load %arg10[%c3_131, %c0_132, %c0_133] : memref<4x1x256xf32, #tpu.memory_space<vmem>>, vector<1x1x256xf32>
    %320 = vector.shape_cast %319 : vector<1x1x256xf32> to vector<1x256xf32>
    %321 = vector.broadcast %320 : vector<1x256xf32> to vector<16x256xf32>
    %322 = arith.addf %318, %321 : vector<16x256xf32>
    %cst_134 = arith.constant 0.000000e+00 : f32
    %323 = vector.broadcast %cst_134 : f32 to vector<16x256xf32>
    %324 = arith.maximumf %322, %323 : vector<16x256xf32>
    %c0_135 = arith.constant 0 : index
    %c0_136 = arith.constant 0 : index
    %325 = vector.load %arg8[%c0_135, %c0_136] : memref<4x256xf32, #tpu.memory_space<vmem>>, vector<4x256xf32>
    %cst_137 = arith.constant dense<0.000000e+00> : vector<16x256xf32>
    %326 = tpu.matmul %315, %325, %cst_137 {dimension_numbers = #tpu.dot_dimension_numbers<[1], [0], [0], [1], [0, 0, 1, 1], [], []>} : vector<16x4xf32>, vector<4x256xf32>, vector<16x256xf32> -> vector<16x256xf32>
    %327 = arith.mulf %324, %326 : vector<16x256xf32>
    %328 = arith.truncf %327 : vector<16x256xf32> to vector<16x256xbf16>
    %c3_138 = arith.constant 3 : index
    %c0_139 = arith.constant 0 : index
    %c0_140 = arith.constant 0 : index
    %329 = vector.load %arg11[%c3_138, %c0_139, %c0_140] : memref<4x256x32xbf16, #tpu.memory_space<vmem>>, vector<1x256x32xbf16>
    %330 = vector.shape_cast %329 : vector<1x256x32xbf16> to vector<256x32xbf16>
    %cst_141 = arith.constant dense<0.000000e+00> : vector<16x32xf32>
    %331 = tpu.matmul %328, %330, %cst_141 {dimension_numbers = #tpu.dot_dimension_numbers<[1], [0], [0], [1], [0, 0, 1, 1], [], []>} : vector<16x256xbf16>, vector<256x32xbf16>, vector<16x32xf32> -> vector<16x32xf32>
    %c3_142 = arith.constant 3 : index
    %c0_143 = arith.constant 0 : index
    %c0_144 = arith.constant 0 : index
    %332 = vector.load %arg12[%c3_142, %c0_143, %c0_144] : memref<4x4x32xf32, #tpu.memory_space<vmem>>, vector<1x4x32xf32>
    %333 = vector.shape_cast %332 : vector<1x4x32xf32> to vector<4x32xf32>
    %cst_145 = arith.constant dense<0.000000e+00> : vector<16x32xf32>
    %334 = tpu.matmul %315, %333, %cst_145 {dimension_numbers = #tpu.dot_dimension_numbers<[1], [0], [0], [1], [0, 0, 1, 1], [], []>} : vector<16x4xf32>, vector<4x32xf32>, vector<16x32xf32> -> vector<16x32xf32>
    %335 = arith.addf %331, %334 : vector<16x32xf32>
    %336 = arith.addf %53, %335 : vector<16x32xf32>
    %c3_146 = arith.constant 3 : index
    %c0_147 = arith.constant 0 : index
    %c0_148 = arith.constant 0 : index
    %337 = vector.load %arg13[%c3_146, %c0_147, %c0_148] : memref<4x1x32xf32, #tpu.memory_space<vmem>>, vector<1x1x32xf32>
    %338 = vector.shape_cast %337 : vector<1x1x32xf32> to vector<1x32xf32>
    %c3_149 = arith.constant 3 : index
    %c0_150 = arith.constant 0 : index
    %c0_151 = arith.constant 0 : index
    %339 = vector.load %arg14[%c3_149, %c0_150, %c0_151] : memref<4x1x32xf32, #tpu.memory_space<vmem>>, vector<1x1x32xf32>
    %340 = vector.shape_cast %339 : vector<1x1x32xf32> to vector<1x32xf32>
    %cst_152 = arith.constant dense<0.000000e+00> : vector<16xf32>
    %341 = vector.multi_reduction <add>, %336, %cst_152 [1] : vector<16x32xf32> to vector<16xf32>
    %342 = vector.shape_cast %341 : vector<16xf32> to vector<16x1xf32>
    %cst_153 = arith.constant 3.200000e+01 : f32
    %343 = vector.broadcast %cst_153 : f32 to vector<16x1xf32>
    %344 = arith.divf %342, %343 : vector<16x1xf32>
    %345 = vector.broadcast %344 : vector<16x1xf32> to vector<16x32xf32>
    %346 = arith.subf %336, %345 : vector<16x32xf32>
    %347 = arith.mulf %346, %346 : vector<16x32xf32>
    %cst_154 = arith.constant dense<0.000000e+00> : vector<16xf32>
    %348 = vector.multi_reduction <add>, %347, %cst_154 [1] : vector<16x32xf32> to vector<16xf32>
    %349 = vector.shape_cast %348 : vector<16xf32> to vector<16x1xf32>
    %cst_155 = arith.constant 3.200000e+01 : f32
    %350 = vector.broadcast %cst_155 : f32 to vector<16x1xf32>
    %351 = arith.divf %349, %350 : vector<16x1xf32>
    %cst_156 = arith.constant 9.99999974E-6 : f32
    %352 = vector.broadcast %cst_156 : f32 to vector<16x1xf32>
    %353 = arith.addf %351, %352 : vector<16x1xf32>
    %354 = math.rsqrt %353 : vector<16x1xf32>
    %355 = vector.broadcast %354 : vector<16x1xf32> to vector<16x32xf32>
    %356 = arith.mulf %346, %355 : vector<16x32xf32>
    %357 = vector.broadcast %338 : vector<1x32xf32> to vector<16x32xf32>
    %358 = arith.mulf %356, %357 : vector<16x32xf32>
    %359 = vector.broadcast %340 : vector<1x32xf32> to vector<16x32xf32>
    %360 = arith.addf %358, %359 : vector<16x32xf32>
    %361 = vector.extract_strided_slice %31 {offsets = [0, 3], sizes = [16, 1], strides = [1, 1]} : vector<16x4xf32> to vector<16x1xf32>
    %362 = vector.broadcast %361 : vector<16x1xf32> to vector<16x32xf32>
    %363 = arith.mulf %362, %360 : vector<16x32xf32>
    %364 = arith.addf %288, %363 : vector<16x32xf32>
    %365 = arith.addf %0, %364 : vector<16x32xf32>
    %c0_157 = arith.constant 0 : index
    %c0_158 = arith.constant 0 : index
    %366 = vector.load %arg15[%c0_157, %c0_158] : memref<16x32xf32, #tpu.memory_space<vmem>>, vector<16x32xf32>
    tpu.vector_store %arg15[%c0_157, %c0_158], %365 {strides = array<i32>} : memref<16x32xf32, #tpu.memory_space<vmem>>, vector<16x32xf32>,
    return
  }
  func.func @transform_0(%arg0: i32) -> (i32, i32) {
    %c0_i32 = arith.constant 0 : i32
    %c0_i32_0 = arith.constant 0 : i32
    return %arg0, %c0_i32 : i32, i32
  }
  func.func @transform_1(%arg0: i32) -> (i32, i32) {
    %c0_i32 = arith.constant 0 : i32
    %c0_i32_0 = arith.constant 0 : i32
    %c0_i32_1 = arith.constant 0 : i32
    return %c0_i32, %c0_i32_0 : i32, i32
  }
  func.func @transform_2(%arg0: i32) -> (i32, i32) {
    %c0_i32 = arith.constant 0 : i32
    %c0_i32_0 = arith.constant 0 : i32
    %c0_i32_1 = arith.constant 0 : i32
    return %c0_i32, %c0_i32_0 : i32, i32
  }
  func.func @transform_3(%arg0: i32) -> (i32, i32) {
    %c0_i32 = arith.constant 0 : i32
    %c0_i32_0 = arith.constant 0 : i32
    %c0_i32_1 = arith.constant 0 : i32
    return %c0_i32, %c0_i32_0 : i32, i32
  }
  func.func @transform_4(%arg0: i32) -> (i32, i32) {
    %c0_i32 = arith.constant 0 : i32
    %c0_i32_0 = arith.constant 0 : i32
    %c0_i32_1 = arith.constant 0 : i32
    return %c0_i32, %c0_i32_0 : i32, i32
  }
  func.func @transform_5(%arg0: i32) -> (i32, i32) {
    %c0_i32 = arith.constant 0 : i32
    %c0_i32_0 = arith.constant 0 : i32
    %c0_i32_1 = arith.constant 0 : i32
    return %c0_i32, %c0_i32_0 : i32, i32
  }
  func.func @transform_6(%arg0: i32) -> (i32, i32) {
    %c0_i32 = arith.constant 0 : i32
    %c0_i32_0 = arith.constant 0 : i32
    %c0_i32_1 = arith.constant 0 : i32
    return %c0_i32, %c0_i32_0 : i32, i32
  }
  func.func @transform_7(%arg0: i32) -> (i32, i32) {
    %c0_i32 = arith.constant 0 : i32
    %c0_i32_0 = arith.constant 0 : i32
    %c0_i32_1 = arith.constant 0 : i32
    return %c0_i32, %c0_i32_0 : i32, i32
  }
  func.func @transform_8(%arg0: i32) -> (i32, i32, i32) {
    %c0_i32 = arith.constant 0 : i32
    %c0_i32_0 = arith.constant 0 : i32
    %c0_i32_1 = arith.constant 0 : i32
    %c0_i32_2 = arith.constant 0 : i32
    return %c0_i32, %c0_i32_0, %c0_i32_1 : i32, i32, i32
  }
  func.func @transform_9(%arg0: i32) -> (i32, i32, i32) {
    %c0_i32 = arith.constant 0 : i32
    %c0_i32_0 = arith.constant 0 : i32
    %c0_i32_1 = arith.constant 0 : i32
    %c0_i32_2 = arith.constant 0 : i32
    return %c0_i32, %c0_i32_0, %c0_i32_1 : i32, i32, i32
  }
  func.func @transform_10(%arg0: i32) -> (i32, i32, i32) {
    %c0_i32 = arith.constant 0 : i32
    %c0_i32_0 = arith.constant 0 : i32
    %c0_i32_1 = arith.constant 0 : i32
    %c0_i32_2 = arith.constant 0 : i32
    return %c0_i32, %c0_i32_0, %c0_i32_1 : i32, i32, i32
  }
  func.func @transform_11(%arg0: i32) -> (i32, i32, i32) {
    %c0_i32 = arith.constant 0 : i32
    %c0_i32_0 = arith.constant 0 : i32
    %c0_i32_1 = arith.constant 0 : i32
    %c0_i32_2 = arith.constant 0 : i32
    return %c0_i32, %c0_i32_0, %c0_i32_1 : i32, i32, i32
  }
  func.func @transform_12(%arg0: i32) -> (i32, i32, i32) {
    %c0_i32 = arith.constant 0 : i32
    %c0_i32_0 = arith.constant 0 : i32
    %c0_i32_1 = arith.constant 0 : i32
    %c0_i32_2 = arith.constant 0 : i32
    return %c0_i32, %c0_i32_0, %c0_i32_1 : i32, i32, i32
  }
  func.func @transform_13(%arg0: i32) -> (i32, i32, i32) {
    %c0_i32 = arith.constant 0 : i32
    %c0_i32_0 = arith.constant 0 : i32
    %c0_i32_1 = arith.constant 0 : i32
    %c0_i32_2 = arith.constant 0 : i32
    return %c0_i32, %c0_i32_0, %c0_i32_1 : i32, i32, i32
  }
  func.func @transform_14(%arg0: i32) -> (i32, i32) {
    %c0_i32 = arith.constant 0 : i32
    %c0_i32_0 = arith.constant 0 : i32
    return %arg0, %c0_i32 : i32, i32
  }
}

</mosaic_0001>

<bundles_post_ra>
// kernel: tpu_custom_call.1
= control target key start
LH: loop header
LB: loop body
LE: loop exit
PB: predicated region body
PF: predicated region fallthrough
CT: control target
= control target key end

     0   :  { %vm62_vm0 = vcmask 261120   ;;  %s3965_s0 = inlined_call_operand.vmem [shape: f32[16,32], index: 0, kind: input, shape index: {}]   ;;  %s3966_s1 = inlined_call_operand.vmem [shape: f32[32,4], index: 1, kind: input, shape index: {}]   ;;  %s3967_s2 = inlined_call_operand.vmem [shape: f32[1,4], index: 2, kind: input, shape index: {}]   ;;  %s3968_s3 = inlined_call_operand.vmem [shape: f32[1,32], index: 3, kind: input, shape index: {}]   ;;  %s3969_s4 = inlined_call_operand.vmem [shape: f32[1,32], index: 4, kind: input, shape index: {}]   ;;  %s3970_s5 = inlined_call_operand.vmem [shape: f32[32,16], index: 5, kind: input, shape index: {}]   ;;  %s3971_s6 = inlined_call_operand.vmem [shape: f32[1,16], index: 6, kind: input, shape index: {}]   ;;  %s3972_s7 = inlined_call_operand.vmem [shape: f32[4,256], index: 7, kind: input, shape index: {}]   ;;  %s3973_s8 = inlined_call_operand.vmem [shape: bf16[4,32,256], index: 8, kind: input, shape index: {}]   ;;  %s3974_s9 = inlined_call_operand.vmem [shape: f32[4,1,256], index: 9, kind: input, shape index: {}]   ;;  %s3975_s10 = inlined_call_operand.vmem [shape: bf16[4,256,32], index: 10, kind: input, shape index: {}]   ;;  %s3976_s11 = inlined_call_operand.vmem [shape: f32[4,4,32], index: 11, kind: input, shape index: {}]   ;;  %s3977_s12 = inlined_call_operand.vmem [shape: f32[4,1,32], index: 12, kind: input, shape index: {}]   ;;  %s3978_s13 = inlined_call_operand.vmem [shape: f32[4,1,32], index: 13, kind: input, shape index: {}]   ;;  %s3979_s14 = inlined_call_operand.hbm [shape: f32[16,32], index: 14, kind: output, shape index: {}]  }
   0x1   :  { %v49_v0 = vld [vmem:[%s3965_s0] sm:$0xff]  ;;  %v50_v1 = vld [vmem:[%s3965_s0 + $0x8] sm:$0xff] }
   0x2   :  { %v191_v2 = vsel %vm62_vm0, %v49_v0, 0.0  ;;  %v194_v3 = vsel %vm62_vm0, %v50_v1, 0.0  ;;  %2849 = vmatprep.mubr.msk.f32.mxu0 %vm62_vm0, %v49_v0 }
   0x3   :  { %192 = vadd.xlane.f32.xlu0 %v191_v2 }
   0x7   :  { %195 = vadd.xlane.f32.xlu0 %v194_v3 }
   0x8   :  { %19 = vsyncpa [#allocation3], 0  ;;  %v51_v14 = vld [vmem:[%s3966_s1] sm:$0xff]  ;;  %v52_v15 = vld [vmem:[%s3966_s1 + $0x8] sm:$0xff]  ;;  %v3114_v30 = vmov 0   ;;  %vm144_vm1 = vcmask 31744  }
   0x9   :  { %v2883_v16 = vpack.c.bf16 %v52_v15, %v51_v14  ;;  %v53_v17 = vld [vmem:[%s3966_s1 + $0x10] sm:$0xff]  ;;  %v54_v18 = vld [vmem:[%s3966_s1 + $0x18] sm:$0xff]  ;;  %v235_v20 = vld [vmem:[%s3970_s5] sm:$0xff]  ;;  %2913 = vset.pattern.permute.xlu1 %v3114_v30  ;;  %2912 = vset.pattern.permute.xlu0 %v3114_v30  ;;  %vm862_vm4 = vcmask 64544   ;;  %vm1395_vm5 = vcmask 97344   ;;  %vm466_vm6 = vcmask 1043456  }
   0xa   :  { %v2887_v19 = vpack.c.bf16 %v54_v18, %v53_v17  ;;  %v236_v21 = vld [vmem:[%s3970_s5 + $0x8] sm:$0xff]  ;;  %v237_v25 = vld [vmem:[%s3970_s5 + $0x10] sm:$0xff]  ;;  %v238_v26 = vld [vmem:[%s3970_s5 + $0x18] sm:$0xff]  ;;  %s3116_s25 = smov 124   ;;  %s3117_s26 = smov 120  }
   0xb   :  { %2884 = vmatprep.subr.bf16.mxu0 %v2883_v16  ;;  %v2891_v22 = vpack.c.bf16 %v236_v21, %v235_v20  ;;  %v2921_v23 = vld [vmem:[%s3973_s8 + $0x4] ss:$8 sps:$4 sm:$0xff]   ;;  %v2919_v24 = vld [vmem:[%s3973_s8] ss:$8 sps:$4 sm:$0xff]   ;;  %v2895_v27 = vpack.c.bf16 %v238_v26, %v237_v25  ;;  %v2924_v28 = vld [vmem:[%s3973_s8 + $0x14] ss:$8 sps:$4 sm:$0xff]  }
   0xc   :  { %2886 = vmatpush3.bf16.msra.mxu0 %v2883_v16  ;;  %v2922_v29 = vld [vmem:[%s3973_s8 + $0x10] ss:$8 sps:$4 sm:$0xff]   ;;  %v2484_v38 = vld [vmem:[%s3968_s3] ss:$0 sm:$0xff]  ;;  %s3122_s15 = smov [#allocation2]  }
   0xd   :  { %2888 = vmatprep.subr.bf16.mxu0 %v2887_v19  ;;  %2892 = vmatprep.subr.bf16.mxu1 %v2891_v22  ;;  %v2485_v40 = vld [vmem:[%s3969_s4] ss:$0 sm:$0xff]  ;;  %s2470_s1 = sshll.u32 %s3122_s15, 4  ;;  %s2471_s1 = int_to_ptr.vmem [resolvable:$true] %s2470_s1 }
   0xe   :  { %2894 = vmatpush3.bf16.msra.mxu1 %v2891_v22  ;;  %v2486_v50 = vld [vmem:[%s3971_s6] ss:$0 sm:$0xff]  ;;  %p3095_p1 = scmp.lt.s32.totalorder %s2471_s1, %s2471_s1 }
   0xf   :  { %2896 = vmatprep.subr.bf16.mxu1 %v2895_v27 }
  0x10   :  { %2890 = vmatpush3.bf16.msra.mxu0 %v2887_v19 }
  0x11   :  { %410 = vmatprep.subr.bf16.mxu0 %v2921_v23 }
  0x12   :  { %2898 = vmatpush3.bf16.msra.mxu1 %v2895_v27 }
  0x13   :  { %2850 = vmatmul.mubr.msk.f32.vlgmr.msra.gmra.mrb[0].mxu0 %vm62_vm0, %v50_v1 }
  0x14   :  { %411 = vmatpush1.bf16.msra.mxu0 %v2919_v24  ;;  %442 = vmatprep.mubr.bf16.mxu0 %v3114_v30 }
  0x15   :  { %412 = vmatprep.subr.bf16.mxu0 %v2924_v28 }
  0x18   :  { %413 = vmatpush1.bf16.msra.mxu0 %v2922_v29 }
  0x90   :  { %v193_v4 = vpop.xlane.xlu0 %192 }
  0x91   :  { %v198_v5 = vmul.f32 0.03125, %v193_v4 }
  0x93   :  { %v200_v6 = vsub.f32 %v49_v0, %v198_v5 }
  0x94   :  { %v196_v7 = vpop.xlane.xlu0 %195 }
  0x95   :  { %v199_v8 = vmul.f32 0.03125, %v196_v7  ;;  %v202_v9 = vmul.f32 %v200_v6, %v200_v6  ;;  %v3317_v7 = vld [vmem:[%s3972_s7] sm:$0xff] }
  0x97   :  { %v201_v10 = vsub.f32 %v50_v1, %v199_v8  ;;  %v204_v11 = vsel %vm62_vm0, %v202_v9, 0.0  ;;  %v3321_v8 = vcombine.high %v3317_v7, %v3317_v7  ;;  %v3115_v9 = vmov 0.0  }
  0x98   :  { %205 = vadd.xlane.f32.xlu1 %v204_v11 }
  0x99   :  { %v203_v12 = vmul.f32 %v201_v10, %v201_v10  ;;  %2494 = vmatprep.subr.msk.mxu1 %vm466_vm6, %v3321_v8 }
  0x9b   :  { %v207_v13 = vsel %vm62_vm0, %v203_v12, 0.0 }
  0x9c   :  { %208 = vadd.xlane.f32.xlu1 %v207_v13 }
  0xe6   :  { %v3271_v48 = vpop.f32.mrb[0].mxu0 }
  0xe7   :  { %v3273_v49 = vpop.f32.mrb[1].mxu0 }
 0x125   :  { %v206_v31 = vpop.xlane.xlu1 %205 }
 0x126   :  { %v210_v32 = vmul.f32 0.03125, %v206_v31 }
 0x128   :  { %v212_v33 = vadd.f32 1e-05, %v210_v32 }
 0x129   :  { %v209_v34 = vpop.xlane.xlu1 %208 }
 0x12a   :  { %3008 = vrsqrt.f32 %v212_v33  ;;  %v211_v35 = vmul.f32 0.03125, %v209_v34 }
 0x12c   :  { %v213_v36 = vadd.f32 1e-05, %v211_v35 }
 0x12e   :  { %3010 = vrsqrt.f32 %v213_v36 }
 0x134   :  { %v3009_v37 = vpop.eup %3008 }
 0x135   :  { %v216_v39 = vmul.f32 %v3009_v37, %v200_v6 }
 0x137   :  { %v224_v41 = vmul.f32 %v2484_v38, %v216_v39 }
 0x138   :  { %v3011_v42 = vpop.eup %3010 }
 0x139   :  { %v3257_v43 = vadd.f32 %v2485_v40, %v224_v41  ;;  %v217_v44 = vmul.f32 %v3011_v42, %v201_v10  ;;  %v586_v10 = vld [vmem:[%s3976_s11] sm:$0xf] }
 0x13b   :  { %v225_v45 = vmul.f32 %v2484_v38, %v217_v44  ;;  %2860 = vmatprep.mubr.msk.f32.mxu1 %vm62_vm0, %v3257_v43 }
 0x13d   :  { %v3261_v46 = vadd.f32 %v2485_v40, %v225_v45 }
 0x13f   :  { %2861 = vmatmul.mubr.msk.f32.vlgmr.msra.gmra.mrb[0].mxu1 %vm62_vm0, %v3261_v46  ;;  %v3267_v47 = vpack.c.bf16 %v3261_v46, %v3257_v43 }
 0x140   :  { %2495 = vmatpush1.msk.msra.mxu1 %vm466_vm6, %v3317_v7  ;;  %535 = vmatprep.mubr.f32.mxu1 %v3115_v9 }
 0x141   :  { %2493 = vmatmul.mubr.msk.bf16.vlgmr.msra.gmra.mrb[4].mxu0 %vm62_vm0, %v3267_v47  ;;  %2863 = vmatprep.subr.msk.mxu1 %vm466_vm6, %v586_v10 }
 0x212   :  { %v2862_v51 = vpop.f32.mrb[0].mxu1 }
 0x213   :  { %v3278_v52 = vadd.f32 %v2862_v51, %v2486_v50  ;;  %v318_v53 = vpop.f32.mrb[1].mxu1 }
 0x214   :  { %v3280_v54 = vadd.f32 %v2486_v50, %v318_v53  ;;  %v3282_v55 = vpop.f32.mrb[4].mxu0 }
 0x215   :  { %v3284_v56 = vpop.f32.mrb[5].mxu0  ;;  %v330_v57 = vsel %vm144_vm1, %v3278_v52, -inf  ;;  %v866_v3 = vsel %vm862_vm4, %v3278_v52, -inf  ;;  %v1399_v5 = vsel %vm1395_vm5, %v3278_v52, -inf }
 0x216   :  { %331 = vmax.xlane.f32.xlu1 %v330_v57  ;;  %v3288_v58 = vpop.f32.mrb[6].mxu0  ;;  %v327_v59 = vsel %vm144_vm1, %v3280_v54, -inf  ;;  %v863_v4 = vsel %vm862_vm4, %v3280_v54, -inf  ;;  %v1396_v6 = vsel %vm1395_vm5, %v3280_v54, -inf }
 0x217   :  { %328 = vmax.xlane.f32.xlu0 %v327_v59  ;;  %v3292_v60 = vpop.f32.mrb[7].mxu0 }
 0x2a3   :  { %v3294_v61 = vpop.xlane.xlu1 %331 }
 0x2a4   :  { %v3296_v62 = vpop.xlane.xlu0 %328  ;;  %vm334_vm2 = vcmp.ge.f32.partialorder %v3278_v52, %v3294_v61  ;;  %v344_v11 = vsub.f32 %v3294_v61, %v3294_v61  ;;  %vm358_vm13 = vcmp.eq.f32.partialorder %v3278_v52, %v3294_v61 }
 0x2a5   :  { %v336_v63 = vsel %vm334_vm2, -1e+30, %v3278_v52  ;;  %vm333_vm3 = vcmp.ge.f32.partialorder %v3280_v54, %v3296_v62  ;;  %v343_v12 = vsub.f32 %v3296_v62, %v3296_v62  ;;  %vm357_vm11 = vcmp.eq.f32.partialorder %v3280_v54, %v3296_v62 }
 0x2a6   :  { %v340_v0 = vsel %vm144_vm1, %v336_v63, -inf  ;;  %v335_v1 = vsel %vm333_vm3, -1e+30, %v3280_v54  ;;  %v347_v13 = vmul.f32 1.442695, %v344_v11  ;;  %v2928_v63 = vld [vmem:[%s3975_s10 + $0x48] sm:$0xff]  }
 0x2a7   :  { %341 = vmax.xlane.f32.xlu1 %v340_v0  ;;  %v337_v2 = vsel %vm144_vm1, %v335_v1, -inf  ;;  %v345_v14 = vmul.f32 1.442695, %v343_v12  ;;  %v2929_v0 = vld [vmem:[%s3975_s10 + $0x8] sm:$0xff]   ;;  %v2930_v1 = vld [vmem:[%s3975_s10 + $0x50] sm:$0xff]  }
 0x2a8   :  { %338 = vmax.xlane.f32.xlu0 %v337_v2  ;;  %3012 = vpow2.f32 %v347_v13  ;;  %v2931_v2 = vld [vmem:[%s3975_s10 + $0x10] sm:$0xff]   ;;  %v2937_v11 = vld [vmem:[%s3975_s10 + $0x28] sm:$0xff]  }
 0x2a9   :  { %3014 = vpow2.f32 %v345_v14  ;;  %v2938_v12 = vld [vmem:[%s3975_s10 + $0x70] sm:$0xff]   ;;  %v2940_v14 = vld [vmem:[%s3975_s10 + $0x78] sm:$0xff]  }
 0x2aa   :  { %v2939_v13 = vld [vmem:[%s3975_s10 + $0x30] sm:$0xff]  }
 0x2ab   :  { %867 = vmax.xlane.f32.xlu1 %v866_v3  ;;  %v2932_v3 = vld [vmem:[%s3975_s10 + $0x58] sm:$0xff]  }
 0x2ac   :  { %864 = vmax.xlane.f32.xlu0 %v863_v4  ;;  %v2933_v4 = vld [vmem:[%s3975_s10 + $0x18] sm:$0xff]  }
 0x2af   :  { %1400 = vmax.xlane.f32.xlu1 %v1399_v5  ;;  %v2934_v5 = vld [vmem:[%s3975_s10 + $0x60] sm:$0xff]  }
 0x2b0   :  { %1397 = vmax.xlane.f32.xlu0 %v1396_v6  ;;  %v2935_v6 = vld [vmem:[%s3975_s10 + $0x20] sm:$0xff]  }
 0x2b2   :  { %v3013_v34 = vpop.eup %3012 }
 0x2b3   :  { %v3015_v35 = vpop.eup %3014 }
 0x334   :  { %v342_v15 = vpop.xlane.xlu1 %341 }
 0x335   :  { %v350_v16 = vsub.f32 %v342_v15, %v3294_v61  ;;  %v339_v17 = vpop.xlane.xlu0 %338  ;;  %vm366_vm14 = vcmp.eq.f32.partialorder %v3278_v52, %v342_v15  ;;  %v2926_v61 = vld [vmem:[%s3975_s10 + $0x40] sm:$0xff]   ;;  %v2941_v15 = vld [vmem:[%s3975_s10 + $0x38] sm:$0xff]  }
 0x336   :  { %v349_v18 = vsub.f32 %v339_v17, %v3296_v62  ;;  %vm365_vm12 = vcmp.eq.f32.partialorder %v3280_v54, %v339_v17  ;;  %v2927_v62 = vld [vmem:[%s3975_s10] sm:$0xff]   ;;  %2744 = vmatprep.subr.bf16.mxu0 %v2926_v61 }
 0x337   :  { %v353_v19 = vmul.f32 1.442695, %v350_v16  ;;  %2745 = vmatpush3.bf16.msra.mxu0 %v2927_v62  ;;  %v2944_v16 = vld [vmem:[%s3973_s8 + $0x24] ss:$8 sps:$4 sm:$0xff]  }
 0x338   :  { %v351_v20 = vmul.f32 1.442695, %v349_v18  ;;  %v3338_v21 = vpop.xlane.xlu1 %867  ;;  %2746 = vmatprep.subr.bf16.mxu0 %v2928_v63 }
 0x339   :  { %3016 = vpow2.f32 %v353_v19  ;;  %v3340_v22 = vpop.xlane.xlu0 %864  ;;  %vm870_vm7 = vcmp.ge.f32.partialorder %v3278_v52, %v3338_v21  ;;  %v880_v17 = vsub.f32 %v3338_v21, %v3338_v21  ;;  %vm894_vm15 = vcmp.eq.f32.partialorder %v3278_v52, %v3338_v21 }
 0x33a   :  { %3018 = vpow2.f32 %v351_v20  ;;  %v872_v23 = vsel %vm870_vm7, -1e+30, %v3278_v52  ;;  %vm869_vm8 = vcmp.ge.f32.partialorder %v3280_v54, %v3340_v22  ;;  %v879_v18 = vsub.f32 %v3340_v22, %v3340_v22 }
 0x33b   :  { %v876_v24 = vsel %vm862_vm4, %v872_v23, -inf  ;;  %v871_v25 = vsel %vm869_vm8, -1e+30, %v3280_v54  ;;  %2747 = vmatpush3.bf16.msra.mxu0 %v2929_v0  ;;  %v883_v19 = vmul.f32 1.442695, %v880_v17  ;;  %vm893_vm3 = vcmp.eq.f32.partialorder %v3280_v54, %v3340_v22 }
 0x33c   :  { %877 = vmax.xlane.f32.xlu1 %v876_v24  ;;  %v3349_v26 = vpop.xlane.xlu1 %1400  ;;  %v873_v27 = vsel %vm862_vm4, %v871_v25, -inf  ;;  %2748 = vmatprep.subr.bf16.mxu0 %v2930_v1  ;;  %v881_v23 = vmul.f32 1.442695, %v879_v18  ;;  %v3448_v1 = vld [vmem:[%s3976_s11 + $0x4] sm:$0xf] }
 0x33d   :  { %874 = vmax.xlane.f32.xlu0 %v873_v27  ;;  %v3352_v28 = vpop.xlane.xlu0 %1397  ;;  %vm1403_vm9 = vcmp.ge.f32.partialorder %v3278_v52, %v3349_v26  ;;  %v1413_v20 = vsub.f32 %v3349_v26, %v3349_v26  ;;  %vm1427_vm8 = vcmp.eq.f32.partialorder %v3278_v52, %v3349_v26 }
 0x33e   :  { %v1405_v29 = vsel %vm1403_vm9, -1e+30, %v3278_v52  ;;  %vm1402_vm10 = vcmp.ge.f32.partialorder %v3280_v54, %v3352_v28  ;;  %v1412_v24 = vsub.f32 %v3352_v28, %v3352_v28 }
 0x33f   :  { %v1409_v31 = vsel %vm1395_vm5, %v1405_v29, -inf  ;;  %v1404_v32 = vsel %vm1402_vm10, -1e+30, %v3280_v54  ;;  %2749 = vmatpush3.bf16.msra.mxu0 %v2931_v2  ;;  %vm1928_vm10 = vcmask 130144  }
 0x340   :  { %1410 = vmax.xlane.f32.xlu1 %v1409_v31  ;;  %v1406_v33 = vsel %vm1395_vm5, %v1404_v32, -inf  ;;  %2750 = vmatprep.subr.bf16.mxu0 %v2932_v3  ;;  %v1416_v32 = vmul.f32 1.442695, %v1413_v20  ;;  %vm1426_vm5 = vcmp.eq.f32.partialorder %v3280_v54, %v3352_v28 }
 0x341   :  { %1407 = vmax.xlane.f32.xlu0 %v1406_v33 }
 0x343   :  { %v3017_v36 = vpop.eup %3016  ;;  %2751 = vmatpush3.bf16.msra.mxu0 %v2933_v4 }
 0x344   :  { %v3019_v37 = vpop.eup %3018  ;;  %v356_v38 = vadd.f32 %v3017_v36, %v3013_v34  ;;  %2752 = vmatprep.subr.bf16.mxu0 %v2934_v5 }
 0x345   :  { %v355_v39 = vadd.f32 %v3019_v37, %v3015_v35 }
 0x346   :  { %3020 = vrcp.f32 %v356_v38 }
 0x347   :  { %3022 = vrcp.f32 %v355_v39  ;;  %2753 = vmatpush3.bf16.msra.mxu0 %v2935_v6 }
 0x348   :  { %3024 = vpow2.f32 %v883_v19 }
 0x349   :  { %3026 = vpow2.f32 %v881_v23 }
 0x350   :  { %v3021_v40 = vpop.eup %3020 }
 0x351   :  { %v3023_v41 = vpop.eup %3022  ;;  %v362_v45 = vmul.f32 %v3021_v40, %v3013_v34  ;;  %v368_v53 = vmul.f32 %v3021_v40, %v3017_v36  ;;  %v1414_v34 = vmul.f32 1.442695, %v1412_v24 }
 0x352   :  { %v360_v42 = vmul.f32 %v3023_v41, %v3015_v35  ;;  %v367_v44 = vmul.f32 %v3023_v41, %v3019_v37 }
 0x353   :  { %v364_v57 = vsel %vm358_vm13, %v362_v45, 0.0 }
 0x354   :  { %v363_v50 = vsel %vm357_vm11, %v360_v42, 0.0  ;;  %v370_v59 = vsel %vm366_vm14, %v368_v53, %v364_v57  ;;  %v3025_v42 = vpop.eup %3024 }
 0x355   :  { %v369_v51 = vsel %vm365_vm12, %v367_v44, %v363_v50  ;;  %v3027_v44 = vpop.eup %3026 }
 0x356   :  { %2496 = vmatmul.mubr.msk.f32.vlgmr.msra.gmra.mrb[2].mxu1 %vm144_vm1, %v369_v51 }
 0x357   :  { %541 = vmatprep.mubr.f32.mxu1 %v3115_v9  ;;  %2864 = vmatpush3.msk.msra.mxu1 %vm466_vm6, %v586_v10  ;;  %v2936_v10 = vld [vmem:[%s3975_s10 + $0x68] sm:$0xff]  }
 0x358   :  { %2529 = vmatprep.subr.msk.mxu1 %vm466_vm6, %v3321_v8  ;;  %2754 = vmatprep.subr.bf16.mxu0 %v2936_v10 }
 0x359   :  { %2755 = vmatpush3.bf16.msra.mxu0 %v2937_v11 }
 0x35a   :  { %2497 = vmatmul.mubr.msk.f32.gmra.mrb[4].mxu1 %vm144_vm1, %v370_v59  ;;  %2756 = vmatprep.subr.bf16.mxu0 %v2938_v12 }
 0x35b   :  { %2865 = vmatprep.mubr.msk.f32.mxu1 %vm144_vm1, %v369_v51 }
 0x35d   :  { %2757 = vmatpush3.bf16.msra.mxu0 %v2939_v13 }
 0x35e   :  { %2866 = vmatmul.mubr.msk.f32.vlgmr.msra.gmra.mrb[6].mxu1 %vm144_vm1, %v370_v59  ;;  %2758 = vmatprep.subr.bf16.mxu0 %v2940_v14 }
 0x35f   :  { %2530 = vmatpush1.msk.msra.mxu1 %vm466_vm6, %v3317_v7  ;;  %1066 = vmatprep.mubr.f32.mxu1 %v3115_v9 }
 0x360   :  { %2868 = vmatprep.subr.msk.mxu1 %vm466_vm6, %v3448_v1 }
 0x361   :  { %2759 = vmatpush3.bf16.msra.mxu0 %v2941_v15 }
 0x362   :  { %945 = vmatprep.subr.bf16.mxu0 %v2944_v16 }
 0x3c9   :  { %v878_v25 = vpop.xlane.xlu1 %877 }
 0x3ca   :  { %v886_v27 = vsub.f32 %v878_v25, %v3338_v21  ;;  %v875_v29 = vpop.xlane.xlu0 %874  ;;  %vm902_vm2 = vcmp.eq.f32.partialorder %v3278_v52, %v878_v25  ;;  %v377_v25 = vlaneseq }
 0x3cb   :  { %v885_v31 = vsub.f32 %v875_v29, %v3340_v22  ;;  %vm901_vm4 = vcmp.eq.f32.partialorder %v3280_v54, %v875_v29 }
 0x3cc   :  { %v889_v33 = vmul.f32 1.442695, %v886_v27  ;;  %v1932_v27 = vsel %vm1928_vm10, %v3278_v52, -inf }
 0x3cd   :  { %v887_v35 = vmul.f32 1.442695, %v885_v31  ;;  %v3440_v36 = vpop.xlane.xlu1 %1410  ;;  %v375_v31 = vld [vmem:[%s3974_s9] sm:$0x3] }
 0x3ce   :  { %3028 = vpow2.f32 %v889_v33  ;;  %v1419_v37 = vsub.f32 %v3440_v36, %v3349_v26  ;;  %v1408_v38 = vpop.xlane.xlu0 %1407  ;;  %vm1435_vm9 = vcmp.eq.f32.partialorder %v3278_v52, %v3440_v36  ;;  %v378_v26 = vshrl.u32 %v377_v25, 7 }
 0x3cf   :  { %3030 = vpow2.f32 %v887_v35  ;;  %v1418_v39 = vsub.f32 %v1408_v38, %v3352_v28  ;;  %vm1434_vm7 = vcmp.eq.f32.partialorder %v3280_v54, %v1408_v38  ;;  %v1929_v28 = vsel %vm1928_vm10, %v3280_v54, -inf }
 0x3d0   :  { %3032 = vpow2.f32 %v1416_v32  ;;  %v1422_v40 = vmul.f32 1.442695, %v1419_v37  ;;  %v3469_v29 = vsub.s32 0, %v378_v26  ;;  %v3474_v32 = vsub.s32 1, %v378_v26 }
 0x3d1   :  { %3034 = vpow2.f32 %v1414_v34  ;;  %v1420_v41 = vmul.f32 1.442695, %v1418_v39 }
 0x3d2   :  { %3036 = vpow2.f32 %v1422_v40  ;;  %v380_v33 = vrot.slane %v375_v31, %v3469_v29  ;;  %v384_v34 = vrot.slane %v375_v31, %v3474_v32 }
 0x3d3   :  { %3038 = vpow2.f32 %v1420_v41 }
 0x3d4   :  { %v445_v35 = vadd.f32 %v3282_v55, %v380_v33  ;;  %v447_v36 = vadd.f32 %v3284_v56, %v384_v34  ;;  %v449_v38 = vadd.f32 %v3288_v58, %v380_v33  ;;  %v451_v40 = vadd.f32 %v3292_v60, %v384_v34  ;;  %v2942_v56 = vld [vmem:[%s3973_s8 + $0x20] ss:$8 sps:$4 sm:$0xff]   ;;  %v2947_v60 = vld [vmem:[%s3973_s8 + $0x34] ss:$8 sps:$4 sm:$0xff]  }
 0x3d5   :  { %v2965_v33 = vld [vmem:[%s3975_s10 + $0x150] sm:$0xff]   ;;  %v2966_v34 = vld [vmem:[%s3975_s10 + $0x98] sm:$0xff]  }
 0x3d6   :  { %v453_v37 = vmax.f32 %v445_v35, 0.0  ;;  %v454_v39 = vmax.f32 %v447_v36, 0.0  ;;  %v2967_v35 = vld [vmem:[%s3975_s10 + $0x110] sm:$0xff]   ;;  %v2968_v36 = vld [vmem:[%s3975_s10 + $0xe0] sm:$0xff]  }
 0x3d8   :  { %v3029_v45 = vpop.eup %3028 }
 0x3d9   :  { %v3031_v50 = vpop.eup %3030  ;;  %v892_v51 = vadd.f32 %v3029_v45, %v3025_v42 }
 0x3da   :  { %v3033_v53 = vpop.eup %3032  ;;  %v891_v57 = vadd.f32 %v3031_v50, %v3027_v44 }
 0x3db   :  { %v3035_v59 = vpop.eup %3034  ;;  %3040 = vrcp.f32 %v892_v51  ;;  %v456_v51 = vmax.f32 %v451_v40, 0.0  ;;  %v2972_v40 = vld [vmem:[%s3975_s10 + $0xe8] sm:$0xff]  }
 0x3dc   :  { %v3037_v61 = vpop.eup %3036  ;;  %3042 = vrcp.f32 %v891_v57 }
 0x3dd   :  { %v3039_v62 = vpop.eup %3038  ;;  %v1425_v63 = vadd.f32 %v3037_v61, %v3033_v53 }
 0x3de   :  { %v1424_v0 = vadd.f32 %v3039_v62, %v3035_v59 }
 0x3df   :  { %3044 = vrcp.f32 %v1425_v63 }
 0x3e0   :  { %3046 = vrcp.f32 %v1424_v0  ;;  %v2945_v0 = vld [vmem:[%s3973_s8 + $0x30] ss:$8 sps:$4 sm:$0xff]  }
 0x3e5   :  { %v3041_v2 = vpop.eup %3040 }
 0x3e6   :  { %v3043_v3 = vpop.eup %3042  ;;  %v898_v4 = vmul.f32 %v3041_v2, %v3025_v42  ;;  %v904_v5 = vmul.f32 %v3041_v2, %v3029_v45  ;;  %v2950_v2 = vld [vmem:[%s3973_s8 + $0x44] ss:$8 sps:$4 sm:$0xff]  }
 0x3e7   :  { %v896_v6 = vmul.f32 %v3043_v3, %v3027_v44  ;;  %v903_v10 = vmul.f32 %v3043_v3, %v3031_v50  ;;  %v455_v50 = vmax.f32 %v449_v38, 0.0  ;;  %v2948_v3 = vld [vmem:[%s3973_s8 + $0x40] ss:$8 sps:$4 sm:$0xff]  }
 0x3e8   :  { %v900_v11 = vsel %vm894_vm15, %v898_v4, 0.0  ;;  %v2953_v4 = vld [vmem:[%s3973_s8 + $0x54] ss:$8 sps:$4 sm:$0xff]   ;;  %v2970_v38 = vld [vmem:[%s3975_s10 + $0xa0] sm:$0xff]  }
 0x3e9   :  { %v3045_v12 = vpop.eup %3044  ;;  %v906_v13 = vsel %vm902_vm2, %v904_v5, %v900_v11  ;;  %v899_v14 = vsel %vm893_vm3, %v896_v6, 0.0  ;;  %v2951_v5 = vld [vmem:[%s3973_s8 + $0x50] ss:$8 sps:$4 sm:$0xff]   ;;  %v2635_v6 = vld [vmem:[%s3976_s11 + $0x8] sm:$0xf] }
 0x3ea   :  { %v3047_v15 = vpop.eup %3046  ;;  %996 = vrot.lane.b32.xlu1 %v906_v13, %s3116_s25  ;;  %v905_v16 = vsel %vm901_vm4, %v903_v10, %v899_v14  ;;  %v1431_v18 = vmul.f32 %v3045_v12, %v3033_v53  ;;  %v1437_v20 = vmul.f32 %v3045_v12, %v3037_v61 }
 0x3eb   :  { %994 = vrot.lane.b32.xlu0 %v905_v16, %s3116_s25  ;;  %v1429_v17 = vmul.f32 %v3047_v15, %v3035_v59  ;;  %v1436_v21 = vmul.f32 %v3047_v15, %v3039_v62  ;;  %v2954_v16 = vld [vmem:[%s3975_s10 + $0xc0] sm:$0xff]  }
 0x3ec   :  { %v1433_v23 = vsel %vm1427_vm8, %v1431_v18, 0.0  ;;  %v2957_v18 = vld [vmem:[%s3975_s10 + $0x140] sm:$0xff]  }
 0x3ed   :  { %v1432_v19 = vsel %vm1426_vm5, %v1429_v17, 0.0  ;;  %v1439_v24 = vsel %vm1435_vm9, %v1437_v20, %v1433_v23  ;;  %v2955_v17 = vld [vmem:[%s3975_s10 + $0x80] sm:$0xff]   ;;  %v2961_v20 = vld [vmem:[%s3975_s10 + $0x148] sm:$0xff]   ;;  %v2960_v23 = vld [vmem:[%s3975_s10 + $0xd0] sm:$0xff]  }
 0x3ee   :  { %v1438_v22 = vsel %vm1434_vm7, %v1436_v21, %v1432_v19  ;;  %v2956_v21 = vld [vmem:[%s3975_s10 + $0xc8] sm:$0xff]   ;;  %v2959_v19 = vld [vmem:[%s3975_s10 + $0x100] sm:$0xff]  }
 0x3ef   :  { %1527 = vrot.lane.b32.xlu1 %v1438_v22, %s3117_s26  ;;  %v2958_v22 = vld [vmem:[%s3975_s10 + $0x88] sm:$0xff]  }
 0x3f3   :  { %1529 = vrot.lane.b32.xlu1 %v1439_v24, %s3117_s26  ;;  %v2963_v24 = vld [vmem:[%s3975_s10 + $0x108] sm:$0xff]  }
 0x40a   :  { %1930 = vmax.xlane.f32.xlu0 %v1929_v28  ;;  %v2962_v28 = vld [vmem:[%s3975_s10 + $0x90] sm:$0xff]  }
 0x417   :  { %1933 = vmax.xlane.f32.xlu1 %v1932_v27  ;;  %v2964_v27 = vld [vmem:[%s3975_s10 + $0xd8] sm:$0xff]  }
 0x429   :  { %v537_v41 = vpop.f32.mrb[2].mxu1 }
 0x42a   :  { %v548_v42 = vmul.f32 %v537_v41, %v453_v37  ;;  %v539_v44 = vpop.f32.mrb[3].mxu1  ;;  %v2969_v37 = vld [vmem:[%s3975_s10 + $0x158] sm:$0xff]   ;;  %v2973_v41 = vld [vmem:[%s3975_s10 + $0x160] sm:$0xff]  }
 0x42b   :  { %v549_v45 = vmul.f32 %v539_v44, %v454_v39  ;;  %v2971_v39 = vld [vmem:[%s3975_s10 + $0x118] sm:$0xff]   ;;  %v2975_v44 = vld [vmem:[%s3975_s10 + $0x120] sm:$0xff]  }
 0x42d   :  { %v543_v53 = vpop.f32.mrb[4].mxu1 }
 0x42e   :  { %v550_v57 = vmul.f32 %v543_v53, %v455_v50  ;;  %v545_v59 = vpop.f32.mrb[5].mxu1  ;;  %v2977_v50 = vld [vmem:[%s3975_s10 + $0x168] sm:$0xff]  }
 0x42f   :  { %v551_v61 = vmul.f32 %v545_v59, %v456_v51  ;;  %v2978_v51 = vld [vmem:[%s3975_s10 + $0xb0] sm:$0xff]   ;;  %v2979_v53 = vld [vmem:[%s3975_s10 + $0x128] sm:$0xff]  }
 0x430   :  { %v552_v62 = vpack.c.bf16 %v550_v57, %v548_v42  ;;  %v2974_v42 = vld [vmem:[%s3975_s10 + $0xa8] sm:$0xff]   ;;  %v2980_v57 = vld [vmem:[%s3975_s10 + $0xf8] sm:$0xff]   ;;  %v2981_v59 = vld [vmem:[%s3975_s10 + $0x170] sm:$0xff]  }
 0x431   :  { %v553_v55 = vpack.c.bf16 %v551_v61, %v549_v45  ;;  %v3482_v63 = vpop.f32.mrb[6].mxu1  ;;  %v2976_v45 = vld [vmem:[%s3975_s10 + $0xf0] sm:$0xff]   ;;  %v2982_v61 = vld [vmem:[%s3975_s10 + $0xb8] sm:$0xff]  }
 0x432   :  { %v3487_v58 = vpop.f32.mrb[7].mxu1 }
 0x433   :  { %793 = vmatprep.mubr.bf16.mxu0 %v553_v55  ;;  %v2984_v55 = vld [vmem:[%s3975_s10 + $0x178] sm:$0xff]  }
 0x434   :  { %794 = vmatmul.mubr.bf16.vlgmr.msra.gmra.mrb[8].mxu0 %v552_v62  ;;  %v2983_v62 = vld [vmem:[%s3975_s10 + $0x130] sm:$0xff]  }
 0x435   :  { %946 = vmatpush1.bf16.msra.mxu0 %v2942_v56  ;;  %977 = vmatprep.mubr.bf16.mxu0 %v3114_v30  ;;  %v2987_v56 = vld [vmem:[%s3973_s8 + $0x64] ss:$8 sps:$4 sm:$0xff]  }
 0x436   :  { %947 = vmatprep.subr.bf16.mxu0 %v2947_v60  ;;  %v2988_v60 = vld [vmem:[%s3975_s10 + $0x138] sm:$0xff]  }
 0x439   :  { %948 = vmatpush1.bf16.msra.mxu0 %v2945_v0 }
 0x43a   :  { %1478 = vmatprep.subr.bf16.mxu0 %v2950_v2 }
 0x43c   :  { %2528 = vmatmul.mubr.msk.bf16.vlgmr.msra.gmra.mrb[12].mxu0 %vm62_vm0, %v3267_v47 }
 0x43d   :  { %1479 = vmatpush1.bf16.msra.mxu0 %v2948_v3  ;;  %1510 = vmatprep.mubr.bf16.mxu0 %v3114_v30 }
 0x43e   :  { %1480 = vmatprep.subr.bf16.mxu0 %v2953_v4 }
 0x441   :  { %1481 = vmatpush1.bf16.msra.mxu0 %v2951_v5 }
 0x442   :  { %2599 = vmatprep.subr.msk.mxu0 %vm466_vm6, %v3321_v8 }
 0x444   :  { %2598 = vmatmul.mubr.msk.bf16.vlgmr.msra.gmra.mrb[16].mxu0 %vm62_vm0, %v3267_v47 }
 0x445   :  { %2600 = vmatpush1.msk.msra.mxu0 %vm466_vm6, %v3317_v7  ;;  %1599 = vmatprep.mubr.f32.mxu0 %v3115_v9 }
 0x446   :  { %2873 = vmatprep.subr.msk.mxu0 %vm466_vm6, %v2635_v6 }
 0x45c   :  { %v997_v10 = vpop.permute.xlu1 %996 }
 0x45d   :  { %v995_v11 = vpop.permute.xlu0 %994 }
 0x45e   :  { %2531 = vmatmul.mubr.msk.f32.vlgmr.msra.gmra.mrb[8].mxu1 %vm144_vm1, %v995_v11 }
 0x45f   :  { %1072 = vmatprep.mubr.f32.mxu1 %v3115_v9  ;;  %2869 = vmatpush3.msk.msra.mxu1 %vm466_vm6, %v3448_v1 }
 0x460   :  { %2769 = vmatprep.subr.bf16.mxu1 %v2954_v16 }
 0x461   :  { %v1528_v12 = vpop.permute.xlu1 %1527 }
 0x462   :  { %2532 = vmatmul.mubr.msk.f32.gmra.mrb[10].mxu1 %vm144_vm1, %v997_v10  ;;  %2601 = vmatmul.mubr.msk.f32.vlgmr.msra.gmra.mrb[2].mxu0 %vm144_vm1, %v1528_v12 }
 0x463   :  { %2870 = vmatprep.mubr.msk.f32.mxu1 %vm144_vm1, %v995_v11  ;;  %1605 = vmatprep.mubr.f32.mxu0 %v3115_v9 }
 0x464   :  { %2874 = vmatpush3.msk.msra.mxu0 %vm466_vm6, %v2635_v6 }
 0x465   :  { %v1530_v13 = vpop.permute.xlu1 %1529  ;;  %2794 = vmatprep.subr.bf16.mxu0 %v2957_v18 }
 0x466   :  { %2871 = vmatmul.mubr.msk.f32.vlgmr.msra.gmra.mrb[12].mxu1 %vm144_vm1, %v997_v10  ;;  %2602 = vmatmul.mubr.msk.f32.gmra.mrb[20].mxu0 %vm144_vm1, %v1530_v13 }
 0x467   :  { %2875 = vmatprep.mubr.msk.f32.mxu0 %vm144_vm1, %v1528_v12  ;;  %2770 = vmatpush3.bf16.msra.mxu1 %v2955_v17 }
 0x468   :  { %2771 = vmatprep.subr.bf16.mxu1 %v2956_v21 }
 0x46a   :  { %2876 = vmatmul.mubr.msk.f32.vlgmr.msra.gmra.mrb[22].mxu0 %vm144_vm1, %v1530_v13 }
 0x46b   :  { %2795 = vmatpush3.bf16.msra.mxu0 %v2959_v19  ;;  %2772 = vmatpush3.bf16.msra.mxu1 %v2958_v22 }
 0x46c   :  { %2796 = vmatprep.subr.bf16.mxu0 %v2961_v20  ;;  %2773 = vmatprep.subr.bf16.mxu1 %v2960_v23 }
 0x46f   :  { %2797 = vmatpush3.bf16.msra.mxu0 %v2963_v24  ;;  %2774 = vmatpush3.bf16.msra.mxu1 %v2962_v28  ;;  %v2593_v28 = vld [vmem:[%s3974_s9 + $0x4] sm:$0x3] }
 0x470   :  { %2775 = vmatprep.subr.bf16.mxu1 %v2964_v27  ;;  %2798 = vmatprep.subr.bf16.mxu0 %v2965_v33  ;;  %v1451_v33 = vrot.slane %v2593_v28, %v3469_v29 }
 0x473   :  { %2776 = vmatpush3.bf16.msra.mxu1 %v2966_v34  ;;  %2799 = vmatpush3.bf16.msra.mxu0 %v2967_v35  ;;  %v1455_v34 = vrot.slane %v2593_v28, %v3474_v32 }
 0x474   :  { %2777 = vmatprep.subr.bf16.mxu1 %v2968_v36  ;;  %2800 = vmatprep.subr.bf16.mxu0 %v2969_v37 }
 0x477   :  { %2778 = vmatpush3.bf16.msra.mxu1 %v2970_v38  ;;  %2801 = vmatpush3.bf16.msra.mxu0 %v2971_v39 }
 0x478   :  { %2779 = vmatprep.subr.bf16.mxu1 %v2972_v40  ;;  %2802 = vmatprep.subr.bf16.mxu0 %v2973_v41 }
 0x47b   :  { %2780 = vmatpush3.bf16.msra.mxu1 %v2974_v42  ;;  %2803 = vmatpush3.bf16.msra.mxu0 %v2975_v44 }
 0x47c   :  { %2781 = vmatprep.subr.bf16.mxu1 %v2976_v45  ;;  %2804 = vmatprep.subr.bf16.mxu0 %v2977_v50 }
 0x47f   :  { %2782 = vmatpush3.bf16.msra.mxu1 %v2978_v51  ;;  %2805 = vmatpush3.bf16.msra.mxu0 %v2979_v53 }
 0x480   :  { %2783 = vmatprep.subr.bf16.mxu1 %v2980_v57  ;;  %2806 = vmatprep.subr.bf16.mxu0 %v2981_v59 }
 0x483   :  { %2784 = vmatpush3.bf16.msra.mxu1 %v2982_v61  ;;  %2807 = vmatpush3.bf16.msra.mxu0 %v2983_v62 }
 0x484   :  { %2808 = vmatprep.subr.bf16.mxu0 %v2984_v55  ;;  %2011 = vmatprep.subr.bf16.mxu1 %v2987_v56 }
 0x487   :  { %2809 = vmatpush3.bf16.msra.mxu0 %v2988_v60 }
 0x488   :  { %2669 = vmatprep.subr.msk.mxu0 %vm466_vm6, %v3321_v8 }
 0x497   :  { %v3535_v1 = vpop.xlane.xlu0 %1930 }
 0x498   :  { %vm1935_vm11 = vcmp.ge.f32.partialorder %v3280_v54, %v3535_v1  ;;  %v1945_v19 = vsub.f32 %v3535_v1, %v3535_v1  ;;  %vm1959_vm13 = vcmp.eq.f32.partialorder %v3280_v54, %v3535_v1 }
 0x499   :  { %v1937_v14 = vsel %vm1935_vm11, -1e+30, %v3280_v54 }
 0x49a   :  { %v1939_v15 = vsel %vm1928_vm10, %v1937_v14, -inf  ;;  %v1947_v22 = vmul.f32 1.442695, %v1945_v19 }
 0x49b   :  { %1940 = vmax.xlane.f32.xlu0 %v1939_v15 }
 0x49c   :  { %3048 = vpow2.f32 %v1947_v22 }
 0x4a4   :  { %v3571_v25 = vpop.xlane.xlu1 %1933 }
 0x4a5   :  { %vm1936_vm12 = vcmp.ge.f32.partialorder %v3278_v52, %v3571_v25  ;;  %v1946_v37 = vsub.f32 %v3571_v25, %v3571_v25  ;;  %vm1960_vm15 = vcmp.eq.f32.partialorder %v3278_v52, %v3571_v25 }
 0x4a6   :  { %v1938_v26 = vsel %vm1936_vm12, -1e+30, %v3278_v52  ;;  %v3049_v60 = vpop.eup %3048 }
 0x4a7   :  { %v1942_v31 = vsel %vm1928_vm10, %v1938_v26, -inf  ;;  %v1949_v57 = vmul.f32 1.442695, %v1946_v37 }
 0x4a8   :  { %1943 = vmax.xlane.f32.xlu0 %v1942_v31 }
 0x507   :  { %v2760_v0 = vpop.f32.mrb[8].mxu0 }
 0x508   :  { %v2761_v2 = vpop.f32.mrb[9].mxu0 }
 0x509   :  { %v2762_v3 = vadd.f32 %v2761_v2, %v2760_v0  ;;  %v2763_v4 = vpop.f32.mrb[10].mxu0 }
 0x50a   :  { %v2764_v5 = vpop.f32.mrb[11].mxu0 }
 0x50b   :  { %v3649_v6 = vadd.f32 %v2762_v3, %v3487_v58  ;;  %v2765_v10 = vadd.f32 %v2764_v5, %v2763_v4  ;;  %v2523_v58 = vld [vmem:[%s3974_s9 + $0x2] sm:$0x3] }
 0x50c   :  { %v918_v20 = vrot.slane %v2523_v58, %v3469_v29  ;;  %v922_v23 = vrot.slane %v2523_v58, %v3474_v32 }
 0x50d   :  { %v3652_v11 = vadd.f32 %v3482_v63, %v2765_v10 }
 0x50f   :  { %v979_v12 = vpop.f32.mrb[12].mxu0 }
 0x510   :  { %v981_v13 = vpop.f32.mrb[13].mxu0  ;;  %v980_v26 = vadd.f32 %v979_v12, %v918_v20 }
 0x511   :  { %v983_v14 = vpop.f32.mrb[14].mxu0  ;;  %v982_v31 = vadd.f32 %v981_v13, %v922_v23 }
 0x512   :  { %v985_v15 = vpop.f32.mrb[15].mxu0  ;;  %v988_v35 = vmax.f32 %v980_v26, 0.0  ;;  %v984_v36 = vadd.f32 %v983_v14, %v918_v20  ;;  %v2991_v26 = vld [vmem:[%s3973_s8 + $0x74] ss:$8 sps:$4 sm:$0xff]  }
 0x513   :  { %v989_v38 = vmax.f32 %v982_v31, 0.0  ;;  %v986_v39 = vadd.f32 %v985_v15, %v922_v23  ;;  %v2985_v23 = vld [vmem:[%s3973_s8 + $0x60] ss:$8 sps:$4 sm:$0xff]  }
 0x514   :  { %v990_v53 = vmax.f32 %v984_v36, 0.0  ;;  %v2989_v36 = vld [vmem:[%s3973_s8 + $0x70] ss:$8 sps:$4 sm:$0xff]   ;;  %s3118_s8 = smov 116  }
 0x515   :  { %v991_v59 = vmax.f32 %v986_v39, 0.0 }
 0x517   :  { %v1512_v16 = vpop.f32.mrb[16].mxu0 }
 0x518   :  { %v1514_v17 = vpop.f32.mrb[17].mxu0  ;;  %v1513_v40 = vadd.f32 %v1512_v16, %v1451_v33 }
 0x519   :  { %v1516_v21 = vpop.f32.mrb[18].mxu0  ;;  %v1515_v42 = vadd.f32 %v1514_v17, %v1455_v34 }
 0x51a   :  { %v1518_v18 = vpop.f32.mrb[19].mxu0  ;;  %v1517_v50 = vadd.f32 %v1516_v21, %v1451_v33  ;;  %v1521_v61 = vmax.f32 %v1513_v40, 0.0 }
 0x51b   :  { %v1519_v62 = vadd.f32 %v1518_v18, %v1455_v34  ;;  %v1522_v0 = vmax.f32 %v1515_v42, 0.0 }
 0x51c   :  { %v1523_v12 = vmax.f32 %v1517_v50, 0.0 }
 0x51d   :  { %v1524_v19 = vmax.f32 %v1519_v62, 0.0 }
 0x528   :  { %v3660_v63 = vpop.xlane.xlu0 %1940 }
 0x529   :  { %v1951_v24 = vsub.f32 %v3660_v63, %v3535_v1  ;;  %vm1967_vm14 = vcmp.eq.f32.partialorder %v3280_v54, %v3660_v63  ;;  %v2481_v63 = vld [vmem:[%s3967_s2] ss:$0 sm:$0xff]  ;;  %s3090_s2 = scalar_lea.vmem %s2471_s1, 256 }
 0x52a   :  { %v3720_v50 = vadd.f32 %v3271_v48, %v2481_v63  ;;  %p3091_p0 = scmp.ne.s32.totalorder %s2471_s1, %s3090_s2  ;;  %p3096_p2 = scmp.lt.s32.totalorder %s3090_s2, %s3090_s2 }
 0x52b   :  { %v1953_v27 = vmul.f32 1.442695, %v1951_v24 }
 0x52c   :  { %p3097_p3 = por %p3096_p2, %p3095_p1 }
 0x52d   :  { %3050 = vpow2.f32 %v1953_v27 }
 0x52e   :  { %3052 = vpow2.f32 %v1949_v57  ;;  %v2992_v57 = vld [vmem:[%s3975_s10 + $0x1c0] sm:$0xff]   ;;  %p3098_p4 = pnand %p3097_p3, %p3091_p0 }
 0x531   :  { %v1068_v41 = vpop.f32.mrb[8].mxu1 }
 0x532   :  { %v1079_v44 = vmul.f32 %v1068_v41, %v988_v35  ;;  %v1070_v45 = vpop.f32.mrb[9].mxu1 }
 0x533   :  { %v1080_v51 = vmul.f32 %v1070_v45, %v989_v38 }
 0x535   :  { %v1074_v55 = vpop.f32.mrb[10].mxu1  ;;  %v3672_v56 = vpop.xlane.xlu0 %1943 }
 0x536   :  { %v1081_v2 = vmul.f32 %v1074_v55, %v990_v53  ;;  %v1952_v3 = vsub.f32 %v3672_v56, %v3571_v25  ;;  %v1601_v4 = vpop.f32.mrb[2].mxu0  ;;  %v1076_v5 = vpop.f32.mrb[11].mxu1  ;;  %vm1968_vm2 = vcmp.eq.f32.partialorder %v3278_v52, %v3672_v56  ;;  %v3725_v53 = vadd.f32 %v2481_v63, %v3273_v49  ;;  %v2993_v49 = vld [vmem:[%s3975_s10 + $0x180] sm:$0xff]   ;;  %v2994_v55 = vld [vmem:[%s3975_s10 + $0x1c8] sm:$0xff]  }
 0x537   :  { %v3051_v10 = vpop.eup %3050  ;;  %v1612_v13 = vmul.f32 %v1601_v4, %v1521_v61  ;;  %v1082_v14 = vmul.f32 %v1076_v5, %v991_v59  ;;  %v1603_v15 = vpop.f32.mrb[3].mxu0  ;;  %v2996_v4 = vld [vmem:[%s3975_s10 + $0x1d0] sm:$0xff]  }
 0x538   :  { %v1957_v16 = vadd.f32 %v3051_v10, %v3049_v60  ;;  %v1083_v17 = vpack.c.bf16 %v1081_v2, %v1079_v44  ;;  %v1955_v21 = vmul.f32 1.442695, %v1952_v3  ;;  %v1613_v18 = vmul.f32 %v1603_v15, %v1522_v0  ;;  %v3053_v38 = vpop.eup %3052  ;;  %v2997_v5 = vld [vmem:[%s3975_s10 + $0x190] sm:$0xff]  }
 0x539   :  { %v1084_v58 = vpack.c.bf16 %v1082_v14, %v1080_v51  ;;  %v3676_v22 = vpop.f32.mrb[12].mxu1  ;;  %v1607_v20 = vpop.f32.mrb[20].mxu0  ;;  %v148_v51 = vsel %vm144_vm1, %v3720_v50, -inf  ;;  %v145_v52 = vsel %vm144_vm1, %v3725_v53, -inf  ;;  %v3760_v3 = vadd.f32 %v3649_v6, %v3257_v43  ;;  %v2998_v6 = vld [vmem:[%s3975_s10 + $0x1d8] sm:$0xff]  }
 0x53a   :  { %3054 = vrcp.f32 %v1957_v16  ;;  %v1614_v24 = vmul.f32 %v1607_v20, %v1523_v12  ;;  %v3681_v28 = vpop.f32.mrb[13].mxu1  ;;  %v1609_v27 = vpop.f32.mrb[21].mxu0  ;;  %v2999_v14 = vld [vmem:[%s3975_s10 + $0x198] sm:$0xff]  }
 0x53b   :  { %3056 = vpow2.f32 %v1955_v21  ;;  %v1615_v31 = vmul.f32 %v1609_v27, %v1524_v19  ;;  %1326 = vmatprep.mubr.bf16.mxu1 %v1084_v58  ;;  %v806_v12 = vsel %vm62_vm0, %v3760_v3, 0.0  ;;  %v3000_v58 = vld [vmem:[%s3975_s10 + $0x1e0] sm:$0xff]  }
 0x53c   :  { %v1616_v33 = vpack.c.bf16 %v1614_v24, %v1612_v13  ;;  %1327 = vmatmul.mubr.bf16.vlgmr.msra.gmra.mrb[16].mxu1 %v1083_v17 }
 0x53d   :  { %v1617_v34 = vpack.c.bf16 %v1615_v31, %v1613_v18  ;;  %v3686_v35 = vpop.f32.mrb[22].mxu0  ;;  %2012 = vmatpush1.bf16.msra.mxu1 %v2985_v23  ;;  %2043 = vmatprep.mubr.bf16.mxu1 %v3114_v30  ;;  %v3001_v23 = vld [vmem:[%s3975_s10 + $0x1a0] sm:$0xff]  }
 0x53e   :  { %v3692_v37 = vpop.f32.mrb[23].mxu0  ;;  %2013 = vmatprep.subr.bf16.mxu1 %v2991_v26 }
 0x53f   :  { %1859 = vmatprep.mubr.bf16.mxu0 %v1617_v34 }
 0x540   :  { %1860 = vmatmul.mubr.bf16.vlgmr.msra.gmra.mrb[24].mxu0 %v1616_v33 }
 0x541   :  { %2014 = vmatpush1.bf16.msra.mxu1 %v2989_v36  ;;  %2670 = vmatpush1.msk.msra.mxu0 %vm466_vm6, %v3317_v7  ;;  %v3002_v36 = vld [vmem:[%s3975_s10 + $0x1e8] sm:$0xff]  }
 0x542   :  { %2132 = vmatprep.mubr.f32.mxu0 %v3115_v9  ;;  %2899 = vmatprep.subr.msk.mxu1 %vm466_vm6, %v3321_v8 }
 0x544   :  { %v3055_v39 = vpop.eup %3054  ;;  %2668 = vmatmul.mubr.msk.bf16.vlgmr.msra.gmra.mrb[20].mxu1 %vm62_vm0, %v3267_v47  ;;  %v2705_v47 = vld [vmem:[%s3976_s11 + $0xc] sm:$0xf] }
 0x545   :  { %v3057_v30 = vpop.eup %3056  ;;  %v1962_v40 = vmul.f32 %v3055_v39, %v3049_v60  ;;  %v1969_v41 = vmul.f32 %v3055_v39, %v3051_v10  ;;  %2900 = vmatpush1.msk.msra.mxu1 %vm466_vm6, %v3317_v7  ;;  %2138 = vmatprep.mubr.f32.mxu1 %v3115_v9  ;;  %v2995_v60 = vld [vmem:[%s3975_s10 + $0x188] sm:$0xff]  }
 0x546   :  { %v1958_v42 = vadd.f32 %v3057_v30, %v3053_v38  ;;  %2878 = vmatprep.subr.msk.mxu1 %vm466_vm6, %v2705_v47 }
 0x547   :  { %v1965_v8 = vsel %vm1959_vm13, %v1962_v40, 0.0 }
 0x548   :  { %3058 = vrcp.f32 %v1958_v42  ;;  %v1971_v44 = vsel %vm1967_vm14, %v1969_v41, %v1965_v8  ;;  %v3005_v41 = vld [vmem:[%s3975_s10 + $0x1b0] sm:$0xff]   ;;  %v3006_v42 = vld [vmem:[%s3975_s10 + $0x1f8] sm:$0xff]  }
 0x549   :  { %2060 = vrot.lane.b32.xlu0 %v1971_v44, %s3118_s8  ;;  %v2663_v44 = vld [vmem:[%s3974_s9 + $0x6] sm:$0x3] }
 0x552   :  { %v3059_v7 = vpop.eup %3058 }
 0x553   :  { %v1964_v9 = vmul.f32 %v3059_v7, %v3053_v38  ;;  %v1970_v45 = vmul.f32 %v3059_v7, %v3057_v30  ;;  %v1984_v7 = vrot.slane %v2663_v44, %v3469_v29 }
 0x555   :  { %v1966_v54 = vsel %vm1960_vm15, %v1964_v9, 0.0 }
 0x556   :  { %v1972_v1 = vsel %vm1968_vm2, %v1970_v45, %v1966_v54  ;;  %v1988_v45 = vrot.slane %v2663_v44, %v3474_v32 }
 0x557   :  { %2062 = vrot.lane.b32.xlu1 %v1972_v1, %s3118_s8 }
 0x568   :  { %149 = vmax.xlane.f32.xlu0 %v148_v51 }
 0x57b   :  { %146 = vmax.xlane.f32.xlu1 %v145_v52 }
 0x5bb   :  { %v2061_v25 = vpop.permute.xlu0 %2060 }
 0x5bc   :  { %2671 = vmatmul.mubr.msk.f32.vlgmr.msra.gmra.mrb[28].mxu0 %vm144_vm1, %v2061_v25 }
 0x5c9   :  { %v2063_v48 = vpop.permute.xlu1 %2062 }
 0x5ca   :  { %2672 = vmatmul.mubr.msk.f32.vlgmr.msra.gmra.mrb[14].mxu1 %vm144_vm1, %v2063_v48 }
 0x5cb   :  { %2880 = vmatprep.mubr.msk.f32.mxu1 %vm144_vm1, %v2061_v25  ;;  %2879 = vmatpush3.msk.msra.mxu1 %vm466_vm6, %v2705_v47 }
 0x5cc   :  { %2819 = vmatprep.subr.bf16.mxu1 %v2992_v57 }
 0x5ce   :  { %2881 = vmatmul.mubr.msk.f32.vlgmr.msra.gmra.mrb[24].mxu1 %vm144_vm1, %v2063_v48 }
 0x5cf   :  { %2820 = vmatpush3.bf16.msra.mxu1 %v2993_v49 }
 0x5d0   :  { %2821 = vmatprep.subr.bf16.mxu1 %v2994_v55 }
 0x5d3   :  { %2822 = vmatpush3.bf16.msra.mxu1 %v2995_v60 }
 0x5d4   :  { %2823 = vmatprep.subr.bf16.mxu1 %v2996_v4 }
 0x5d7   :  { %2824 = vmatpush3.bf16.msra.mxu1 %v2997_v5 }
 0x5d8   :  { %2825 = vmatprep.subr.bf16.mxu1 %v2998_v6 }
 0x5db   :  { %2826 = vmatpush3.bf16.msra.mxu1 %v2999_v14 }
 0x5dc   :  { %2827 = vmatprep.subr.bf16.mxu1 %v3000_v58 }
 0x5df   :  { %2828 = vmatpush3.bf16.msra.mxu1 %v3001_v23 }
 0x5e0   :  { %2829 = vmatprep.subr.bf16.mxu1 %v3002_v36 }
 0x5f5   :  { %v3740_v59 = vpop.xlane.xlu0 %149 }
 0x5f6   :  { %vm152_vm3 = vcmp.ge.f32.partialorder %v3720_v50, %v3740_v59  ;;  %v162_v8 = vsub.f32 %v3740_v59, %v3740_v59 }
 0x5f7   :  { %v154_v61 = vsel %vm152_vm3, -1e+30, %v3720_v50 }
 0x5f8   :  { %v158_v62 = vsel %vm144_vm1, %v154_v61, -inf  ;;  %v165_v47 = vmul.f32 1.442695, %v162_v8 }
 0x5f9   :  { %159 = vmax.xlane.f32.xlu1 %v158_v62 }
 0x5fa   :  { %3060 = vpow2.f32 %v165_v47 }
 0x604   :  { %v3061_v62 = vpop.eup %3060 }
 0x608   :  { %v3749_v56 = vpop.xlane.xlu1 %146 }
 0x609   :  { %vm151_vm6 = vcmp.ge.f32.partialorder %v3725_v53, %v3749_v56  ;;  %v161_v29 = vsub.f32 %v3749_v56, %v3749_v56  ;;  %vm175_vm5 = vcmp.eq.f32.partialorder %v3725_v53, %v3749_v56 }
 0x60a   :  { %v153_v0 = vsel %vm151_vm6, -1e+30, %v3725_v53 }
 0x60b   :  { %v155_v2 = vsel %vm144_vm1, %v153_v0, -inf  ;;  %v163_v0 = vmul.f32 1.442695, %v161_v29  ;;  %vm176_vm1 = vcmp.eq.f32.partialorder %v3720_v50, %v3740_v59  ;;  %v3119_v29 = vmov 1  }
 0x60c   :  { %156 = vmax.xlane.f32.xlu0 %v155_v2 }
 0x60f   :  { %v2785_v10 = vpop.f32.mrb[16].mxu1 }
 0x610   :  { %807 = vadd.xlane.f32.xlu0 %v806_v12  ;;  %v2786_v13 = vpop.f32.mrb[17].mxu1 }
 0x611   :  { %v2787_v15 = vadd.f32 %v2786_v13, %v2785_v10  ;;  %v2788_v16 = vpop.f32.mrb[18].mxu1 }
 0x612   :  { %v2789_v17 = vpop.f32.mrb[19].mxu1 }
 0x613   :  { %v3777_v21 = vadd.f32 %v2787_v15, %v3681_v28  ;;  %v2790_v18 = vadd.f32 %v2789_v17, %v2788_v16  ;;  %v2810_v19 = vpop.f32.mrb[24].mxu0 }
 0x614   :  { %v2811_v20 = vpop.f32.mrb[25].mxu0 }
 0x615   :  { %v3786_v24 = vadd.f32 %v3676_v22, %v2790_v18  ;;  %v2812_v27 = vadd.f32 %v2811_v20, %v2810_v19  ;;  %v2813_v26 = vpop.f32.mrb[26].mxu0  ;;  %v3003_v22 = vld [vmem:[%s3975_s10 + $0x1a8] sm:$0xff]  }
 0x616   :  { %v2814_v31 = vpop.f32.mrb[27].mxu0  ;;  %2830 = vmatpush3.bf16.msra.mxu1 %v3003_v22 }
 0x617   :  { %v3789_v28 = vadd.f32 %v2812_v27, %v3692_v37  ;;  %v2815_v33 = vadd.f32 %v2814_v31, %v2813_v26  ;;  %v2045_v34 = vpop.f32.mrb[20].mxu1  ;;  %v3004_v37 = vld [vmem:[%s3975_s10 + $0x1f0] sm:$0xff]  }
 0x618   :  { %v2047_v38 = vpop.f32.mrb[21].mxu1  ;;  %2831 = vmatprep.subr.bf16.mxu1 %v3004_v37  ;;  %v2046_v63 = vadd.f32 %v2045_v34, %v1984_v7 }
 0x619   :  { %v3798_v39 = vadd.f32 %v3686_v35, %v2815_v33  ;;  %v2049_v30 = vpop.f32.mrb[22].mxu1  ;;  %v3007_v35 = vld [vmem:[%s3975_s10 + $0x1b8] sm:$0xff]   ;;  %v2048_v51 = vadd.f32 %v2047_v38, %v1988_v45 }
 0x61a   :  { %v2051_v40 = vpop.f32.mrb[23].mxu1  ;;  %2832 = vmatpush3.bf16.msra.mxu1 %v3005_v41  ;;  %v2054_v52 = vmax.f32 %v2046_v63, 0.0  ;;  %v2050_v32 = vadd.f32 %v2049_v30, %v1984_v7  ;;  %v1868_v63 = vadd.f32 %v3789_v28, %v3257_v43 }
 0x61b   :  { %2833 = vmatprep.subr.bf16.mxu1 %v3006_v42  ;;  %v2055_v25 = vmax.f32 %v2048_v51, 0.0  ;;  %v2052_v2 = vadd.f32 %v2051_v40, %v1988_v45 }
 0x61c   :  { %v2056_v10 = vmax.f32 %v2050_v32, 0.0  ;;  %v1874_v51 = vsel %vm62_vm0, %v1868_v63, 0.0 }
 0x61d   :  { %v2057_v6 = vmax.f32 %v2052_v2, 0.0 }
 0x61e   :  { %2834 = vmatpush3.bf16.msra.mxu1 %v3007_v35 }
 0x686   :  { %v160_v9 = vpop.xlane.xlu1 %159 }
 0x687   :  { %v168_v54 = vsub.f32 %v160_v9, %v3740_v59  ;;  %vm184_vm4 = vcmp.eq.f32.partialorder %v3720_v50, %v160_v9  ;;  %v803_v50 = vadd.f32 %v3652_v11, %v3261_v46 }
 0x689   :  { %v171_v1 = vmul.f32 1.442695, %v168_v54  ;;  %v809_v41 = vsel %vm62_vm0, %v803_v50, 0.0  ;;  %v1336_v54 = vadd.f32 %v3786_v24, %v3261_v46 }
 0x68b   :  { %3062 = vpow2.f32 %v171_v1  ;;  %v1344_v1 = vsel %vm62_vm0, %v1336_v54, 0.0 }
 0x68f   :  { %v2134_v57 = vpop.f32.mrb[28].mxu0 }
 0x690   :  { %v2145_v48 = vmul.f32 %v2134_v57, %v2054_v52  ;;  %v2136_v49 = vpop.f32.mrb[29].mxu0  ;;  %v1869_v52 = vadd.f32 %v3798_v39, %v3261_v46 }
 0x691   :  { %v2146_v61 = vmul.f32 %v2136_v49, %v2055_v25 }
 0x695   :  { %v3063_v55 = vpop.eup %3062 }
 0x696   :  { %v174_v60 = vadd.f32 %v3063_v55, %v3061_v62 }
 0x698   :  { %3064 = vrcp.f32 %v174_v60 }
 0x699   :  { %v157_v4 = vpop.xlane.xlu0 %156  ;;  %3066 = vpow2.f32 %v163_v0 }
 0x69a   :  { %v167_v5 = vsub.f32 %v157_v4, %v3749_v56  ;;  %vm183_vm7 = vcmp.eq.f32.partialorder %v3725_v53, %v157_v4 }
 0x69c   :  { %v169_v12 = vmul.f32 1.442695, %v167_v5 }
 0x69d   :  { %v2140_v13 = vpop.f32.mrb[14].mxu1  ;;  %v808_v37 = vpop.xlane.xlu0 %807 }
 0x69e   :  { %3068 = vpow2.f32 %v169_v12  ;;  %v2147_v14 = vmul.f32 %v2140_v13, %v2056_v10  ;;  %v2142_v15 = vpop.f32.mrb[15].mxu1  ;;  %v812_v42 = vmul.f32 0.03125, %v808_v37 }
 0x69f   :  { %v2148_v16 = vmul.f32 %v2142_v15, %v2057_v6 }
 0x6a0   :  { %v2149_v17 = vpack.c.bf16 %v2147_v14, %v2145_v48  ;;  %v3839_v35 = vsub.f32 %v3760_v3, %v812_v42  ;;  %v1335_v3 = vadd.f32 %v3777_v21, %v3257_v43  ;;  %v1877_v21 = vsel %vm62_vm0, %v1869_v52, 0.0 }
 0x6a1   :  { %v2150_v18 = vpack.c.bf16 %v2148_v16, %v2146_v61  ;;  %v2882_v19 = vpop.f32.mrb[24].mxu1 }
 0x6a2   :  { %v3065_v58 = vpop.eup %3064  ;;  %v2255_v20 = vpop.f32.mrb[25].mxu1  ;;  %v816_v56 = vmul.f32 %v3839_v35, %v3839_v35  ;;  %v1341_v45 = vsel %vm62_vm0, %v1335_v3, 0.0 }
 0x6a3   :  { %2392 = vmatprep.mubr.bf16.mxu1 %v2150_v18  ;;  %v180_v23 = vmul.f32 %v3065_v58, %v3061_v62  ;;  %v186_v27 = vmul.f32 %v3065_v58, %v3063_v55  ;;  %v3067_v33 = vpop.eup %3066 }
 0x6a4   :  { %2393 = vmatmul.mubr.bf16.vlgmr.msra.gmra.mrb[28].mxu1 %v2149_v17  ;;  %v818_v53 = vsel %vm62_vm0, %v816_v56, 0.0 }
 0x6a5   :  { %v182_v26 = vsel %vm176_vm1, %v180_v23, 0.0 }
 0x6a6   :  { %v3826_v31 = vsel %vm184_vm4, %v186_v27, %v182_v26 }
 0x6a7   :  { %855 = vperm.xlu1 %2913, %v3826_v31  }
 0x6a8   :  { %v3069_v34 = vpop.eup %3068 }
 0x6a9   :  { %v173_v36 = vadd.f32 %v3069_v34, %v3067_v33 }
 0x6ab   :  { %3070 = vrcp.f32 %v173_v36  ;;  %2915 = vset.pattern.permute.xlu1 %v3119_v29 }
 0x6b5   :  { %v3071_v38 = vpop.eup %3070 }
 0x6b6   :  { %v178_v22 = vmul.f32 %v3071_v38, %v3067_v33  ;;  %v185_v30 = vmul.f32 %v3071_v38, %v3069_v34  ;;  %v3120_v33 = vmov 3   ;;  %v3121_v34 = vmov 2  }
 0x6b8   :  { %v181_v59 = vsel %vm175_vm5, %v178_v22, 0.0 }
 0x6b9   :  { %v3832_v40 = vsel %vm183_vm7, %v185_v30, %v181_v59 }
 0x6ba   :  { %850 = vperm.xlu0 %2912, %v3832_v40  }
 0x6be   :  { %2914 = vset.pattern.permute.xlu0 %v3119_v29 }
 0x6cb   :  { %810 = vadd.xlane.f32.xlu1 %v809_v41 }
 0x6d9   :  { %819 = vadd.xlane.f32.xlu0 %v818_v53 }
 0x726   :  { %v3844_v8 = vpop.permute.xlu1 %855 }
 0x758   :  { %v811_v44 = vpop.xlane.xlu1 %810 }
 0x759   :  { %v813_v47 = vmul.f32 0.03125, %v811_v44  ;;  %v3905_v44 = vpop.permute.xlu0 %850 }
 0x75b   :  { %v3846_v7 = vsub.f32 %v803_v50, %v813_v47 }
 0x75d   :  { %v817_v11 = vmul.f32 %v3846_v7, %v3846_v7 }
 0x75f   :  { %v821_v9 = vsel %vm62_vm0, %v817_v11, 0.0 }
 0x760   :  { %822 = vadd.xlane.f32.xlu1 %v821_v9 }
 0x764   :  { %1342 = vadd.xlane.f32.xlu1 %v1341_v45 }
 0x766   :  { %v820_v11 = vpop.xlane.xlu0 %819 }
 0x768   :  { %1345 = vadd.xlane.f32.xlu1 %v1344_v1 }
 0x76c   :  { %1875 = vadd.xlane.f32.xlu1 %v1874_v51 }
 0x770   :  { %1878 = vadd.xlane.f32.xlu1 %v1877_v21 }
 0x777   :  { %v2835_v25 = vpop.f32.mrb[28].mxu1 }
 0x778   :  { %v2836_v57 = vpop.f32.mrb[29].mxu1 }
 0x779   :  { %v2837_v48 = vadd.f32 %v2836_v57, %v2835_v25  ;;  %v2838_v24 = vpop.f32.mrb[30].mxu1 }
 0x77a   :  { %v2839_v49 = vpop.f32.mrb[31].mxu1 }
 0x77b   :  { %v2395_v61 = vadd.f32 %v2837_v48, %v2255_v20  ;;  %v2840_v62 = vadd.f32 %v2839_v49, %v2838_v24 }
 0x77d   :  { %v2398_v55 = vadd.f32 %v2882_v19, %v2840_v62  ;;  %v2401_v12 = vadd.f32 %v2395_v61, %v3257_v43 }
 0x77f   :  { %v2407_v16 = vsel %vm62_vm0, %v2401_v12, 0.0  ;;  %v2402_v18 = vadd.f32 %v2398_v55, %v3261_v46 }
 0x781   :  { %v2410_v43 = vsel %vm62_vm0, %v2402_v18, 0.0 }
 0x7ed   :  { %v3863_v28 = vpop.xlane.xlu1 %822 }
 0x7ee   :  { %v825_v21 = vmul.f32 0.03125, %v3863_v28 }
 0x7f0   :  { %v827_v24 = vadd.f32 1e-05, %v825_v21 }
 0x7f1   :  { %v1343_v60 = vpop.xlane.xlu1 %1342 }
 0x7f2   :  { %v1347_v32 = vmul.f32 0.03125, %v1343_v60 }
 0x7f4   :  { %v3865_v39 = vsub.f32 %v1335_v3, %v1347_v32  ;;  %v824_v3 = vmul.f32 0.03125, %v820_v11 }
 0x7f5   :  { %v1346_v0 = vpop.xlane.xlu1 %1345 }
 0x7f6   :  { %v1348_v2 = vmul.f32 0.03125, %v1346_v0  ;;  %v1351_v4 = vmul.f32 %v3865_v39, %v3865_v39 }
 0x7f8   :  { %v3869_v5 = vsub.f32 %v1336_v54, %v1348_v2  ;;  %v1353_v10 = vsel %vm62_vm0, %v1351_v4, 0.0 }
 0x7f9   :  { %1354 = vadd.xlane.f32.xlu1 %v1353_v10  ;;  %v1876_v6 = vpop.xlane.xlu1 %1875  ;;  %v2587_v10 = vld [vmem:[%s3977_s12 + $0x1] ss:$0 sm:$0xff] }
 0x7fa   :  { %v1880_v13 = vmul.f32 0.03125, %v1876_v6  ;;  %v1352_v14 = vmul.f32 %v3869_v5, %v3869_v5 }
 0x7fc   :  { %v3875_v15 = vsub.f32 %v1868_v63, %v1880_v13  ;;  %v1356_v17 = vsel %vm62_vm0, %v1352_v14, 0.0 }
 0x7fd   :  { %2408 = vadd.xlane.f32.xlu1 %v2407_v16  ;;  %1357 = vadd.xlane.f32.xlu0 %v1356_v17  ;;  %v1879_v19 = vpop.xlane.xlu1 %1878  ;;  %v2517_v17 = vld [vmem:[%s3977_s12] ss:$0 sm:$0xff] }
 0x7fe   :  { %v1881_v58 = vmul.f32 0.03125, %v1879_v19  ;;  %v1884_v23 = vmul.f32 %v3875_v15, %v3875_v15 }
 0x800   :  { %v3880_v20 = vsub.f32 %v1869_v52, %v1881_v58  ;;  %v1886_v27 = vsel %vm62_vm0, %v1884_v23, 0.0  ;;  %v826_v52 = vadd.f32 1e-05, %v824_v3 }
 0x801   :  { %2411 = vadd.xlane.f32.xlu1 %v2410_v43  ;;  %v2588_v43 = vld [vmem:[%s3978_s13 + $0x1] ss:$0 sm:$0xff] }
 0x802   :  { %v1885_v26 = vmul.f32 %v3880_v20, %v3880_v20 }
 0x804   :  { %v1889_v46 = vsel %vm62_vm0, %v1885_v26, 0.0  ;;  %v2518_v26 = vld [vmem:[%s3978_s13] ss:$0 sm:$0xff] }
 0x805   :  { %1887 = vadd.xlane.f32.xlu1 %v1886_v27 }
 0x809   :  { %1890 = vadd.xlane.f32.xlu1 %v1889_v46  ;;  %v2658_v46 = vld [vmem:[%s3978_s13 + $0x2] ss:$0 sm:$0xff] }
 0x813   :  { %1384 = vperm.xlu0 %2914, %v3832_v40  }
 0x817   :  { %2918 = vset.pattern.permute.xlu0 %v3120_v33 }
 0x818   :  { %2454 = vperm.xlu0 %2918, %v3826_v31  }
 0x81a   :  { %1388 = vperm.xlu1 %2915, %v3826_v31  }
 0x81e   :  { %2916 = vset.pattern.permute.xlu1 %v3121_v34 }
 0x81f   :  { %1917 = vperm.xlu1 %2916, %v3832_v40  }
 0x823   :  { %1921 = vperm.xlu1 %2916, %v3826_v31  }
 0x827   :  { %2917 = vset.pattern.permute.xlu1 %v3120_v33 }
 0x886   :  { %v1355_v36 = vpop.xlane.xlu1 %1354 }
 0x887   :  { %v1359_v9 = vmul.f32 0.03125, %v1355_v36 }
 0x889   :  { %v1361_v63 = vadd.f32 1e-05, %v1359_v9 }
 0x88a   :  { %v2409_v38 = vpop.xlane.xlu1 %2408  ;;  %v1358_v45 = vpop.xlane.xlu0 %1357 }
 0x88b   :  { %v2413_v22 = vmul.f32 0.03125, %v2409_v38  ;;  %v1360_v51 = vmul.f32 0.03125, %v1358_v45  ;;  %3072 = vrsqrt.f32 %v1361_v63 }
 0x88c   :  { %3074 = vrsqrt.f32 %v826_v52 }
 0x88d   :  { %v3894_v30 = vsub.f32 %v2401_v12, %v2413_v22 }
 0x88e   :  { %v2412_v59 = vpop.xlane.xlu1 %2411 }
 0x88f   :  { %v2414_v50 = vmul.f32 0.03125, %v2412_v59  ;;  %v2417_v37 = vmul.f32 %v3894_v30, %v3894_v30 }
 0x891   :  { %v3898_v41 = vsub.f32 %v2402_v18, %v2414_v50  ;;  %v2419_v42 = vsel %vm62_vm0, %v2417_v37, 0.0 }
 0x892   :  { %2420 = vadd.xlane.f32.xlu1 %v2419_v42  ;;  %v1888_v53 = vpop.xlane.xlu1 %1887  ;;  %v1385_v59 = vpop.permute.xlu0 %1384 }
 0x893   :  { %v2418_v56 = vmul.f32 %v3898_v41, %v3898_v41  ;;  %v1892_v1 = vmul.f32 0.03125, %v1888_v53 }
 0x895   :  { %v2422_v31 = vsel %vm62_vm0, %v2418_v56, 0.0  ;;  %v1894_v25 = vadd.f32 1e-05, %v1892_v1  ;;  %v3073_v55 = vpop.eup %3072 }
 0x896   :  { %2423 = vadd.xlane.f32.xlu1 %v2422_v31  ;;  %v1891_v47 = vpop.xlane.xlu1 %1890  ;;  %v3075_v60 = vpop.eup %3074  ;;  %v1365_v28 = vmul.f32 %v3073_v55, %v3865_v39  ;;  %v2657_v39 = vld [vmem:[%s3977_s12 + $0x2] ss:$0 sm:$0xff]  ;;  %v2728_v31 = vld [vmem:[%s3978_s13 + $0x3] ss:$0 sm:$0xff] }
 0x897   :  { %v1893_v57 = vmul.f32 0.03125, %v1891_v47  ;;  %3076 = vrsqrt.f32 %v1894_v25  ;;  %v830_v13 = vmul.f32 %v3075_v60, %v3839_v35 }
 0x898   :  { %v1373_v19 = vmul.f32 %v2587_v10, %v1365_v28 }
 0x899   :  { %v1895_v49 = vadd.f32 1e-05, %v1893_v57 }
 0x89a   :  { %v3907_v54 = vpop.permute.xlu1 %1388 }
 0x89e   :  { %v1918_v48 = vpop.permute.xlu1 %1917 }
 0x8a1   :  { %v3077_v32 = vpop.eup %3076 }
 0x8a2   :  { %v1922_v61 = vpop.permute.xlu1 %1921  ;;  %v1898_v14 = vmul.f32 %v3077_v32, %v3875_v15  ;;  %v838_v15 = vmul.f32 %v2517_v17, %v830_v13 }
 0x8a4   :  { %v1906_v23 = vmul.f32 %v2657_v39, %v1898_v14  ;;  %v846_v36 = vadd.f32 %v2518_v26, %v838_v15 }
 0x8a6   :  { %v1914_v38 = vadd.f32 %v2658_v46, %v1906_v23  ;;  %v858_v53 = vmul.f32 %v3905_v44, %v846_v36 }
 0x8a7   :  { %2450 = vperm.xlu1 %2917, %v3832_v40   ;;  %v1362_v40 = vadd.f32 1e-05, %v1360_v51 }
 0x8a8   :  { %v1924_v47 = vmul.f32 %v1918_v48, %v1914_v38  ;;  %v2455_v48 = vpop.permute.xlu0 %2454 }
 0x8a9   :  { %3078 = vrsqrt.f32 %v1362_v40 }
 0x8aa   :  { %3080 = vrsqrt.f32 %v827_v24 }
 0x8ab   :  { %3082 = vrsqrt.f32 %v1895_v49 }
 0x8b3   :  { %v3079_v4 = vpop.eup %3078 }
 0x8b4   :  { %v3081_v6 = vpop.eup %3080  ;;  %v1366_v58 = vmul.f32 %v3079_v4, %v3869_v5  ;;  %v1381_v5 = vadd.f32 %v2588_v43, %v1373_v19 }
 0x8b5   :  { %v3083_v16 = vpop.eup %3082  ;;  %v831_v35 = vmul.f32 %v3081_v6, %v3846_v7 }
 0x8b6   :  { %v1899_v27 = vmul.f32 %v3083_v16, %v3880_v20  ;;  %v1374_v33 = vmul.f32 %v2587_v10, %v1366_v58  ;;  %v2727_v20 = vld [vmem:[%s3977_s12 + $0x3] ss:$0 sm:$0xff]  ;;  %v1391_v50 = vmul.f32 %v1385_v59, %v1381_v5 }
 0x8b7   :  { %v839_v34 = vmul.f32 %v2517_v17, %v831_v35 }
 0x8b8   :  { %v1907_v22 = vmul.f32 %v2657_v39, %v1899_v27  ;;  %v1382_v37 = vadd.f32 %v2588_v43, %v1374_v33  ;;  %v1393_v45 = vadd.f32 %v1391_v50, %v858_v53 }
 0x8b9   :  { %v847_v56 = vadd.f32 %v2518_v26, %v839_v34 }
 0x8ba   :  { %v1915_v11 = vadd.f32 %v2658_v46, %v1907_v22  ;;  %v1392_v1 = vmul.f32 %v3907_v54, %v1382_v37  ;;  %v1926_v21 = vadd.f32 %v1924_v47, %v1393_v45  ;;  %v3088_v54 = vld [vmem:[%s3965_s0] sm:$0xff] }
 0x8bb   :  { %v859_v52 = vmul.f32 %v3844_v8, %v847_v56  ;;  %v3089_v8 = vld [vmem:[%s3965_s0 + $0x8] sm:$0xff] }
 0x8bc   :  { %v1925_v25 = vmul.f32 %v1922_v61, %v1915_v11 }
 0x8bd   :  { %v1394_v24 = vadd.f32 %v1392_v1, %v859_v52 }
 0x91f   :  { %v2421_v62 = vpop.xlane.xlu1 %2420 }
 0x920   :  { %v2425_v29 = vmul.f32 0.03125, %v2421_v62  ;;  %v1927_v62 = vadd.f32 %v1925_v25, %v1394_v24 }
 0x922   :  { %v2427_v0 = vadd.f32 1e-05, %v2425_v29 }
 0x923   :  { %v2424_v2 = vpop.xlane.xlu1 %2423 }
 0x924   :  { %3084 = vrsqrt.f32 %v2427_v0  ;;  %v2426_v12 = vmul.f32 0.03125, %v2424_v2 }
 0x926   :  { %v2428_v18 = vadd.f32 1e-05, %v2426_v12 }
 0x928   :  { %3086 = vrsqrt.f32 %v2428_v18 }
 0x92e   :  { %v3085_v7 = vpop.eup %3084 }
 0x92f   :  { %v2431_v42 = vmul.f32 %v3085_v7, %v3894_v30  ;;  %v2451_v30 = vpop.permute.xlu1 %2450 }
 0x931   :  { %v2439_v9 = vmul.f32 %v2727_v20, %v2431_v42 }
 0x932   :  { %v3087_v3 = vpop.eup %3086 }
 0x933   :  { %v2432_v63 = vmul.f32 %v3087_v3, %v3898_v41  ;;  %v2447_v51 = vadd.f32 %v2728_v31, %v2439_v9 }
 0x935   :  { %v2440_v57 = vmul.f32 %v2727_v20, %v2432_v63  ;;  %v2457_v40 = vmul.f32 %v2451_v30, %v2447_v51 }
 0x937   :  { %v2448_v49 = vadd.f32 %v2728_v31, %v2440_v57  ;;  %v2459_v44 = vadd.f32 %v2457_v40, %v1926_v21 }
 0x939   :  { %v2458_v55 = vmul.f32 %v2455_v48, %v2448_v49  ;;  %v2461_v29 = vadd.f32 %v3088_v54, %v2459_v44 }
 0x93b   :  { %v2460_v41 = vadd.f32 %v2458_v55, %v1927_v62  ;;  %2463 = vst.msk [vmem:[#allocation2] sm:$0xff] %vm62_vm0, %v2461_v29 }
 0x93d   :  { %v2462_v61 = vadd.f32 %v3089_v8, %v2460_v41 }
 0x93f   :  { %2464 = vst.msk [vmem:[#allocation2 + $0x8] sm:$0xff] %vm62_vm0, %v2462_v61 }
 0x940   :  { %3101 = shalt.err (!%p3098_p4)
}
 0x941   :  { %s3102_s19 = scalar_lea.hbm %s3979_s14, 256 }
 0x942   :  { %p3103_p5 = scmp.ne.s32.totalorder %s3979_s14, %s3102_s19  ;;  %p3106_p6 = scmp.lt.u32.totalorder %s3102_s19, %s3979_s14 }
 0x944   :  { %p3108_p7 = pnand %p3106_p6, %p3103_p5 }
 0x946   :  { %3111 = shalt.err (!%p3108_p7)
}
 0x947   :  { %s3123_s9 = smov 128   ;;  %s3124_s10 = smov 8  }
 0x948   :  { %2476 = dma.vmem_to_hbm [thread:$0]  %s2471_s1, 256, %s3979_s14, [#allocation3], %s3123_s9, %s3123_s9, %s3124_s10  }
 0x949   :  { %3112 = dma.done.wait [#allocation3], 256  }
 0x94a   :  { %3113 = vsyncadd [#allocation3], 4294967040 }
 0x94b   :  { %2480 = vsyncpa [#allocation3], 1 }

</bundles_post_ra>
